<compile_context>
chip_gen: v7x
topology: tpu7x:2x2x1
jax: 0.10.0
libtpu: 0.0.40
codegen_flags: <defaults>
</compile_context>

<pallas_src>
import math
import numpy as np
import jax
import jax.numpy as jnp
from jax import lax
from jax.experimental import pallas as pl
from jax.experimental.pallas import tpu as pltpu

OUT_SIZE = 7          # MultiScaleRoIAlign(output_size=7)
SAMPLING_RATIO = 2    # MultiScaleRoIAlign(sampling_ratio=2)


# ----------------------------- Conv2d 3x3 (reduce_dim) -----------------------------

def _make_conv_kernel(H, W, K3):
    HW = H * W

    def kernel(x_ref, w_ref, b_ref, o_ref, acc_ref):
        # x_ref:  (1, H+2, W, K3) bf16   -- kw taps pre-stacked along the channel axis
        # w_ref:  (n_co, 3, K3, tco) bf16 -- whole weight, VMEM-resident (constant block)
        # b_ref:  (n_co, 1, tco) f32
        # o_ref:  (1, HW, tco) bf16       acc_ref: (HW, tco) f32 scratch
        j = pl.program_id(1)
        for kh in range(3):
            # Shift only along the leading (non-tiled) H axis -> no relayout.
            xt = x_ref[0, pl.ds(kh, H), :, :].reshape(HW, K3)
            part = jnp.dot(xt, w_ref[j, kh], preferred_element_type=jnp.float32)
            if kh == 0:
                acc_ref[...] = part        # per-tap VMEM accumulation (bounded live range)
            else:
                acc_ref[...] += part
        o_ref[0] = (acc_ref[...] + b_ref[j]).astype(o_ref.dtype)

    return kernel


def conv3x3_nhwc_pallas(x, w, b, *, co_tile=256):
    """3x3 / stride 1 / pad 1 conv with bias.

    x: [N, C_in, H, W] f32, w: [C_out, C_in, 3, 3] (OIHW), b: [C_out].
    Returns [N, H*W, C_out] bf16 (NHWC with spatial flattened, lane-dense C_out).
    """
    N, C_in, H, W = x.shape
    C_out = w.shape[0]
    HW = H * W
    Hp = H + 2
    K3 = 3 * C_in

    tco = min(co_tile, C_out)
    assert C_out % tco == 0, "C_out must be divisible by the C_out tile"
    n_co = C_out // tco

    # Glue: pad + pre-shift the 3 kw windows along the channel axis + NHWC + bf16.
    xp = jnp.pad(x, ((0, 0), (0, 0), (1, 1), (1, 1)))                    # [N, Ci, Hp, Wp]
    xs = jnp.concatenate([xp[:, :, :, kw:kw + W] for kw in range(3)], axis=1)
    xl = jnp.transpose(xs, (0, 2, 3, 1)).astype(jnp.bfloat16)            # [N, Hp, W, K3]
    wl = jnp.transpose(w, (2, 3, 1, 0)).reshape(3, K3, C_out)            # [(kh), kw*Ci+ci, co]
    wl = wl.reshape(3, K3, n_co, tco).transpose(2, 0, 1, 3).astype(jnp.bfloat16)
    bl = b.reshape(n_co, 1, tco).astype(jnp.float32)

    grid_spec = pltpu.PrefetchScalarGridSpec(
        num_scalar_prefetch=0,
        grid=(N, n_co),
        in_specs=[
            pl.BlockSpec((1, Hp, W, K3), lambda n, j: (n, 0, 0, 0)),
            pl.BlockSpec((n_co, 3, K3, tco), lambda n, j: (0, 0, 0, 0)),   # resident weights
            pl.BlockSpec((n_co, 1, tco), lambda n, j: (0, 0, 0)),
        ],
        out_specs=pl.BlockSpec((1, HW, tco), lambda n, j: (n, 0, j)),
        scratch_shapes=[pltpu.VMEM((HW, tco), jnp.float32)],
    )
    return pl.pallas_call(
        _make_conv_kernel(H, W, K3),
        out_shape=jax.ShapeDtypeStruct((N, HW, C_out), jnp.bfloat16),
        grid_spec=grid_spec,
        compiler_params=pltpu.CompilerParams(
            dimension_semantics=("parallel", "parallel"),
            vmem_limit_bytes=36 * 1024 * 1024),
    )(xl, wl, bl)


def conv3x3_pallas(x, w, b):
    """Same conv, returned in NCHW f32 (module layout of features['0'])."""
    N, _, H, W = x.shape
    C_out = w.shape[0]
    y = conv3x3_nhwc_pallas(x, w, b)                      # [N, H*W, C_out] bf16
    return y.astype(jnp.float32).reshape(N, H, W, C_out).transpose(0, 3, 1, 2)


# ----------------------------- MultiScaleRoIAlign (single level) -----------------------------

def _make_roi_kernel(H, W, scale, roi_batch):

    def axis_weights(start, bin_sz, size, pidx, gidx):
        # Separable bilinear weights summed over the sampling grid, built on a SMALL
        # [49, size] grid (folded valid-mask / top-clamp -> few VPU passes).
        size_f = float(size)
        tot = jnp.zeros(pidx.shape, jnp.float32)
        for s in range(SAMPLING_RATIO):
            coord = start + (pidx + (s + 0.5) / SAMPLING_RATIO) * bin_sz
            valid = jnp.logical_and(coord >= -1.0, coord <= size_f)
            c = jnp.maximum(coord, 0.0)
            low = jnp.floor(c)
            top = low >= size_f - 1.0
            lo = jnp.where(top, size_f - 1.0, low)
            lfrac = jnp.where(top, 0.0, c - low)
            tot = tot + jnp.where(jnp.logical_and(valid, gidx == lo), 1.0 - lfrac, 0.0)
            tot = tot + jnp.where(jnp.logical_and(valid, gidx == low + 1.0), lfrac, 0.0)
        return tot

    def kernel(gb_ref, boxes_ref, yidx_ref, xidx_ref, eh_ref, ew_ref, feat_ref, out_ref):
        # gb_ref: SMEM [G] i32 (group -> image), boxes_ref: SMEM [4*R_pad] f32.
        # yidx_ref: (2, 49, H), xidx_ref: (2, 49, W) constant (p,h) / (q,w) grids, f32.
        # eh_ref: (H, HW) f32 one-hot expansion (k//W == h) * 1/sample_count.
        # ew_ref: (W, HW) f32 one-hot expansion (k%W  == w).
        # feat_ref: (1, HW, C) bf16,  out_ref: (roi_batch, 49, C) f32.
        g = pl.program_id(0)
        pgrid = yidx_ref[0]
        hgrid = yidx_ref[1]
        qgrid = xidx_ref[0]
        wgrid = xidx_ref[1]
        for t in range(roi_batch):
            r = g * roi_batch + t
            x1 = boxes_ref[4 * r + 0] * scale
            y1 = boxes_ref[4 * r + 1] * scale
            x2 = boxes_ref[4 * r + 2] * scale
            y2 = boxes_ref[4 * r + 3] * scale
            bin_w = jnp.maximum(x2 - x1, 1.0) / OUT_SIZE   # torchvision roi_align, aligned=False
            bin_h = jnp.maximum(y2 - y1, 1.0) / OUT_SIZE
            ytot = axis_weights(y1, bin_h, H, pgrid, hgrid)            # [49, H]
            xtot = axis_weights(x1, bin_w, W, qgrid, wgrid)            # [49, W]
            # Expand to [49, HW] on the MXU via constant one-hot matrices
            # (1/sample_count is folded into eh -> no extra VPU pass).
            ybig = jnp.dot(ytot, eh_ref[...], preferred_element_type=jnp.float32)
            xbig = jnp.dot(xtot, ew_ref[...], preferred_element_type=jnp.float32)
            bmat = (ybig * xbig).astype(jnp.bfloat16)                  # [49, HW]
            out_ref[t] = jnp.dot(bmat, feat_ref[0],
                                 preferred_element_type=jnp.float32)   # [49, C], lane-dense

    return kernel


def roi_align_pallas(feat_flat, H, W, group_bidx, boxes, scale, *, roi_batch=8):
    """feat_flat: [N, H*W, C] bf16; group_bidx: [G] i32 (group -> image index);
    boxes: [R_pad, 4] f32 with R_pad = G * roi_batch (x1,y1,x2,y2).
    Returns [R_pad, 49, C] f32 (lane-dense channels)."""
    N, HW, C = feat_flat.shape
    assert HW == H * W
    R_pad = boxes.shape[0]
    assert R_pad % roi_batch == 0 and R_pad // roi_batch == group_bidx.shape[0]
    G = R_pad // roi_batch
    PQ = OUT_SIZE * OUT_SIZE

    # Constant, ROI-independent grids & expansion matrices (DMA'd once, VMEM-resident).
    rbin = np.arange(PQ)
    yidx = np.stack([np.broadcast_to((rbin // OUT_SIZE)[:, None], (PQ, H)),
                     np.broadcast_to(np.arange(H)[None, :], (PQ, H))]).astype(np.float32)
    xidx = np.stack([np.broadcast_to((rbin % OUT_SIZE)[:, None], (PQ, W)),
                     np.broadcast_to(np.arange(W)[None, :], (PQ, W))]).astype(np.float32)
    kcol = np.arange(HW)
    inv_count = 1.0 / float(SAMPLING_RATIO * SAMPLING_RATIO)
    eh = np.equal.outer(np.arange(H), kcol // W).astype(np.float32) * inv_count   # [H, HW]
    ew = np.equal.outer(np.arange(W), kcol % W).astype(np.float32)                # [W, HW]

    grid_spec = pltpu.PrefetchScalarGridSpec(
        num_scalar_prefetch=2,                           # (group->image idx, flat boxes) in SMEM
        grid=(G,),
        in_specs=[
            pl.BlockSpec((2, PQ, H), lambda g, gb, bx: (0, 0, 0)),
            pl.BlockSpec((2, PQ, W), lambda g, gb, bx: (0, 0, 0)),
            pl.BlockSpec((H, HW), lambda g, gb, bx: (0, 0)),
            pl.BlockSpec((W, HW), lambda g, gb, bx: (0, 0)),
            pl.BlockSpec((1, HW, C), lambda g, gb, bx: (gb[g], 0, 0)),
        ],
        out_specs=pl.BlockSpec((roi_batch, PQ, C), lambda g, gb, bx: (g, 0, 0)),
    )
    return pl.pallas_call(
        _make_roi_kernel(H, W, float(scale), roi_batch),
        out_shape=jax.ShapeDtypeStruct((R_pad, PQ, C), jnp.float32),
        grid_spec=grid_spec,
        compiler_params=pltpu.CompilerParams(
            dimension_semantics=("parallel",),
            vmem_limit_bytes=8 * 1024 * 1024),
    )(group_bidx.astype(jnp.int32), boxes.reshape(-1).astype(jnp.float32),
      jnp.asarray(yidx), jnp.asarray(xidx), jnp.asarray(eh), jnp.asarray(ew), feat_flat)


# ----------------------------- SSDRPN.forward -----------------------------

def ssd_rpn_forward(features, proposals, w, b, image_size, *, roi_batch=8):
    """features: {'0': [N, C_in, H, W]}; proposals: list (per image) of [R_i, 4] (x1,y1,x2,y2).
    Returns [sum_i R_i, C_out, 7, 7] f32 (MultiScaleRoIAlign layout)."""
    x = features["0"]
    N, _, H, W = x.shape
    C_out = w.shape[0]
    feat_flat = conv3x3_nhwc_pallas(x, w, b)                 # reduce_dim, [N, H*W, C_out] bf16

    # MultiScaleRoIAlign.infer_scale: 2**round(log2(feat/image)), per spatial dim.
    sy = 2.0 ** round(math.log2(float(H) / float(image_size)))
    sx = 2.0 ** round(math.log2(float(W) / float(image_size)))
    assert sy == sx, "non-square feature/image scale not supported"  # TODO(synk): per-dim scales
    scale = sy

    counts = [int(p.shape[0]) for p in proposals]
    R = sum(counts)
    if R == 0:
        return jnp.zeros((0, C_out, OUT_SIZE, OUT_SIZE), jnp.float32)

    # Pad each image's ROIs to a multiple of roi_batch so every grid step (a group of
    # roi_batch ROIs) reads exactly one feature block.  Padded rows are dropped below.
    padded, gbidx, pad_counts = [], [], []
    for i, p in enumerate(proposals):
        ri = counts[i]
        rp = ((ri + roi_batch - 1) // roi_batch) * roi_batch
        pad_counts.append(rp)
        if rp == 0:
            continue
        pb = jnp.concatenate([jnp.asarray(p, jnp.float32),
                              jnp.zeros((rp - ri, 4), jnp.float32)], axis=0)
        padded.append(pb)
        gbidx.extend([i] * (rp // roi_batch))
    boxes_p = jnp.concatenate(padded, axis=0)                # [R_pad, 4]
    gbidx = jnp.asarray(gbidx, jnp.int32)                    # [G]

    out_pad = roi_align_pallas(feat_flat, H, W, gbidx, boxes_p, scale,
                               roi_batch=roi_batch)          # [R_pad, 49, C_out]

    # Drop padded rows (original ROI order preserved: concatenated image-by-image).
    pieces, off = [], 0
    for i in range(N):
        if counts[i] > 0:
            pieces.append(out_pad[off: off + counts[i]])
        off += pad_counts[i]
    out = jnp.concatenate(pieces, axis=0)                    # [R, 49, C_out]
    # Module layout (R, C, 7, 7).  If the downstream consumer flattens to (R, 49*C),
    # keep `out` as-is and skip this relayout.
    return out.reshape(R, OUT_SIZE, OUT_SIZE, C_out).transpose(0, 3, 1, 2)


# ----------------------------- references (for correctness check) -----------------------------

def _conv_ref(x, w, b):
    y = lax.conv_general_dilated(
        x, w, window_strides=(1, 1), padding=((1, 1), (1, 1)),
        dimension_numbers=("NCHW", "OIHW", "NCHW"),
        precision=lax.Precision.HIGHEST)
    return y + b[None, :, None, None]


def _roi_align_ref(feat, bidx, boxes, scale):
    feat = np.asarray(feat, np.float64)
    boxes = np.asarray(boxes, np.float64)
    bidx = np.asarray(bidx)
    _, C, H, W = feat.shape
    R = boxes.shape[0]

    def bilinear(f, y, x):
        if y < -1.0 or y > H or x < -1.0 or x > W:
            return np.zeros((C,), np.float64)
        y = max(y, 0.0)
        x = max(x, 0.0)
        y_low = int(y)
        x_low = int(x)
        if y_low >= H - 1:
            y_high = y_low = H - 1
            y = float(y_low)
        else:
            y_high = y_low + 1
        if x_low >= W - 1:
            x_high = x_low = W - 1
            x = float(x_low)
        else:
            x_high = x_low + 1
        ly, lx = y - y_low, x - x_low
        hy, hx = 1.0 - ly, 1.0 - lx
        return (hy * hx * f[:, y_low, x_low] + hy * lx * f[:, y_low, x_high]
                + ly * hx * f[:, y_high, x_low] + ly * lx * f[:, y_high, x_high])

    out = np.zeros((R, C, OUT_SIZE, OUT_SIZE), np.float64)
    for r in range(R):
        f = feat[bidx[r]]
        x1, y1, x2, y2 = boxes[r] * scale
        roi_w = max(x2 - x1, 1.0)
        roi_h = max(y2 - y1, 1.0)
        bw = roi_w / OUT_SIZE
        bh = roi_h / OUT_SIZE
        for ph in range(OUT_SIZE):
            for pw in range(OUT_SIZE):
                acc = np.zeros((C,), np.float64)
                for iy in range(SAMPLING_RATIO):
                    y = y1 + ph * bh + (iy + 0.5) * bh / SAMPLING_RATIO
                    for ix in range(SAMPLING_RATIO):
                        x = x1 + pw * bw + (ix + 0.5) * bw / SAMPLING_RATIO
                        acc += bilinear(f, y, x)
                out[r, :, ph, pw] = acc / (SAMPLING_RATIO * SAMPLING_RATIO)
    return out


# ----------------------------- main -----------------------------

if __name__ == "__main__":
    key = jax.random.PRNGKey(0)
    # Small, module-consistent shapes (real module uses C_in=1024 -> C_out=512).
    N, C_in, C_out, H, W = 2, 32, 16, 16, 16
    IMAGE_SIZE = 128  # cfg.INPUT.IMAGE_SIZE

    k1, k2, k3, k4, k5 = jax.random.split(key, 5)
    feat0 = jax.random.normal(k1, (N, C_in, H, W), jnp.float32)
    conv_w = jax.random.normal(k2, (C_out, C_in, 3, 3), jnp.float32) * 0.05
    conv_b = jax.random.normal(k3, (C_out,), jnp.float32) * 0.05

    def make_boxes(k, n):
        ka, kb = jax.random.split(k)
        tl = jax.random.uniform(ka, (n, 2), minval=0.0, maxval=IMAGE_SIZE * 0.6)
        wh = jax.random.uniform(kb, (n, 2), minval=8.0, maxval=IMAGE_SIZE * 0.4)
        return jnp.concatenate([tl, tl + wh], axis=1).astype(jnp.float32)

    proposals = [make_boxes(k4, 3), make_boxes(k5, 4)]   # per-image boxes (x1,y1,x2,y2)
    features = {"0": feat0}

    obj_feat = ssd_rpn_forward(features, proposals, conv_w, conv_b, IMAGE_SIZE)
    obj_feat = jax.block_until_ready(obj_feat)
    assert obj_feat.shape == (7, C_out, OUT_SIZE, OUT_SIZE)

    # Correctness: conv kernel vs XLA conv (bf16 MXU operands/output, f32 accumulation),
    # RoIAlign kernel vs direct numpy reference on the Pallas conv output.
    conv_k = jax.block_until_ready(conv3x3_pallas(feat0, conv_w, conv_b))
    conv_r = _conv_ref(feat0, conv_w, conv_b)
    np.testing.assert_allclose(np.asarray(conv_k), np.asarray(conv_r), rtol=3e-2, atol=3e-2)

    scale = 2.0 ** round(math.log2(float(H) / float(IMAGE_SIZE)))
    bidx = jnp.concatenate([jnp.full((p.shape[0],), i, jnp.int32)
                            for i, p in enumerate(proposals)])
    boxes = jnp.concatenate(proposals, axis=0)
    roi_r = _roi_align_ref(conv_k, bidx, boxes, scale)
    np.testing.assert_allclose(np.asarray(obj_feat), roi_r, rtol=3e-2, atol=3e-2)

    print("KERNEL_OK")
</pallas_src>

<mosaic_0001>
module attributes {stable_mosaic.version = 11 : i64} {
  func.func @kernel(%arg0: i32, %arg1: i32, %arg2: memref<1x18x16x96xbf16, #tpu.memory_space<vmem>>, %arg3: memref<1x3x96x16xbf16, #tpu.memory_space<vmem>>, %arg4: memref<1x1x16xf32, #tpu.memory_space<vmem>>, %arg5: memref<1x256x16xbf16, #tpu.memory_space<vmem>>, %arg6: memref<256x16xf32, #tpu.memory_space<vmem>>) attributes {dimension_semantics = [#tpu.dimension_semantics<parallel>, #tpu.dimension_semantics<parallel>], iteration_bounds = array<i64: 2, 1>, scalar_prefetch = 0 : i64, scratch_operands = 1 : i64, tpu.core_type = #tpu.core_type<tc>, window_params = [{transform_indices = @transform_0, window_bounds = array<i64: 1, 18, 16, 96>}, {pipeline_mode = #tpu.pipeline_mode<synchronous>, transform_indices = @transform_1, window_bounds = array<i64: 1, 3, 96, 16>}, {pipeline_mode = #tpu.pipeline_mode<synchronous>, transform_indices = @transform_2, window_bounds = array<i64: 1, 1, 16>}, {transform_indices = @transform_3, window_bounds = array<i64: 1, 256, 16>}]} {
    %c0 = arith.constant 0 : index
    %c0_0 = arith.constant 0 : index
    %c0_1 = arith.constant 0 : index
    %c0_2 = arith.constant 0 : index
    %0 = vector.load %arg2[%c0, %c0_0, %c0_1, %c0_2] : memref<1x18x16x96xbf16, #tpu.memory_space<vmem>>, vector<1x16x16x96xbf16>
    %1 = vector.shape_cast %0 : vector<1x16x16x96xbf16> to vector<16x16x96xbf16>
    %2 = vector.shape_cast %1 : vector<16x16x96xbf16> to vector<256x96xbf16>
    %3 = arith.index_cast %arg1 : i32 to index
    %c0_3 = arith.constant 0 : index
    %c0_4 = arith.constant 0 : index
    %c0_5 = arith.constant 0 : index
    %4 = vector.load %arg3[%3, %c0_3, %c0_4, %c0_5] : memref<1x3x96x16xbf16, #tpu.memory_space<vmem>>, vector<1x1x96x16xbf16>
    %5 = vector.shape_cast %4 : vector<1x1x96x16xbf16> to vector<96x16xbf16>
    %cst = arith.constant dense<0.000000e+00> : vector<256x16xf32>
    %6 = tpu.matmul %2, %5, %cst {dimension_numbers = #tpu.dot_dimension_numbers<[1], [0], [0], [1], [0, 0, 1, 1], [], []>} : vector<256x96xbf16>, vector<96x16xbf16>, vector<256x16xf32> -> vector<256x16xf32>
    %c0_6 = arith.constant 0 : index
    %c0_7 = arith.constant 0 : index
    %7 = vector.load %arg6[%c0_6, %c0_7] : memref<256x16xf32, #tpu.memory_space<vmem>>, vector<256x16xf32>
    tpu.vector_store %arg6[%c0_6, %c0_7], %6 {strides = array<i32>} : memref<256x16xf32, #tpu.memory_space<vmem>>, vector<256x16xf32>,
    %c0_8 = arith.constant 0 : index
    %c1 = arith.constant 1 : index
    %c0_9 = arith.constant 0 : index
    %c0_10 = arith.constant 0 : index
    %8 = vector.load %arg2[%c0_8, %c1, %c0_9, %c0_10] : memref<1x18x16x96xbf16, #tpu.memory_space<vmem>>, vector<1x16x16x96xbf16>
    %9 = vector.shape_cast %8 : vector<1x16x16x96xbf16> to vector<16x16x96xbf16>
    %10 = vector.shape_cast %9 : vector<16x16x96xbf16> to vector<256x96xbf16>
    %11 = arith.index_cast %arg1 : i32 to index
    %c1_11 = arith.constant 1 : index
    %c0_12 = arith.constant 0 : index
    %c0_13 = arith.constant 0 : index
    %12 = vector.load %arg3[%11, %c1_11, %c0_12, %c0_13] : memref<1x3x96x16xbf16, #tpu.memory_space<vmem>>, vector<1x1x96x16xbf16>
    %13 = vector.shape_cast %12 : vector<1x1x96x16xbf16> to vector<96x16xbf16>
    %cst_14 = arith.constant dense<0.000000e+00> : vector<256x16xf32>
    %14 = tpu.matmul %10, %13, %cst_14 {dimension_numbers = #tpu.dot_dimension_numbers<[1], [0], [0], [1], [0, 0, 1, 1], [], []>} : vector<256x96xbf16>, vector<96x16xbf16>, vector<256x16xf32> -> vector<256x16xf32>
    %c0_15 = arith.constant 0 : index
    %c0_16 = arith.constant 0 : index
    %15 = vector.load %arg6[%c0_15, %c0_16] : memref<256x16xf32, #tpu.memory_space<vmem>>, vector<256x16xf32>
    %16 = arith.addf %15, %14 : vector<256x16xf32>
    %c0_17 = arith.constant 0 : index
    %c0_18 = arith.constant 0 : index
    %17 = vector.load %arg6[%c0_17, %c0_18] : memref<256x16xf32, #tpu.memory_space<vmem>>, vector<256x16xf32>
    tpu.vector_store %arg6[%c0_17, %c0_18], %16 {strides = array<i32>} : memref<256x16xf32, #tpu.memory_space<vmem>>, vector<256x16xf32>,
    %c0_19 = arith.constant 0 : index
    %c2 = arith.constant 2 : index
    %c0_20 = arith.constant 0 : index
    %c0_21 = arith.constant 0 : index
    %18 = vector.load %arg2[%c0_19, %c2, %c0_20, %c0_21] : memref<1x18x16x96xbf16, #tpu.memory_space<vmem>>, vector<1x16x16x96xbf16>
    %19 = vector.shape_cast %18 : vector<1x16x16x96xbf16> to vector<16x16x96xbf16>
    %20 = vector.shape_cast %19 : vector<16x16x96xbf16> to vector<256x96xbf16>
    %21 = arith.index_cast %arg1 : i32 to index
    %c2_22 = arith.constant 2 : index
    %c0_23 = arith.constant 0 : index
    %c0_24 = arith.constant 0 : index
    %22 = vector.load %arg3[%21, %c2_22, %c0_23, %c0_24] : memref<1x3x96x16xbf16, #tpu.memory_space<vmem>>, vector<1x1x96x16xbf16>
    %23 = vector.shape_cast %22 : vector<1x1x96x16xbf16> to vector<96x16xbf16>
    %cst_25 = arith.constant dense<0.000000e+00> : vector<256x16xf32>
    %24 = tpu.matmul %20, %23, %cst_25 {dimension_numbers = #tpu.dot_dimension_numbers<[1], [0], [0], [1], [0, 0, 1, 1], [], []>} : vector<256x96xbf16>, vector<96x16xbf16>, vector<256x16xf32> -> vector<256x16xf32>
    %c0_26 = arith.constant 0 : index
    %c0_27 = arith.constant 0 : index
    %25 = vector.load %arg6[%c0_26, %c0_27] : memref<256x16xf32, #tpu.memory_space<vmem>>, vector<256x16xf32>
    %26 = arith.addf %25, %24 : vector<256x16xf32>
    %c0_28 = arith.constant 0 : index
    %c0_29 = arith.constant 0 : index
    %27 = vector.load %arg6[%c0_28, %c0_29] : memref<256x16xf32, #tpu.memory_space<vmem>>, vector<256x16xf32>
    tpu.vector_store %arg6[%c0_28, %c0_29], %26 {strides = array<i32>} : memref<256x16xf32, #tpu.memory_space<vmem>>, vector<256x16xf32>,
    %c0_30 = arith.constant 0 : index
    %c0_31 = arith.constant 0 : index
    %28 = vector.load %arg6[%c0_30, %c0_31] : memref<256x16xf32, #tpu.memory_space<vmem>>, vector<256x16xf32>
    %29 = arith.index_cast %arg1 : i32 to index
    %c0_32 = arith.constant 0 : index
    %c0_33 = arith.constant 0 : index
    %30 = vector.load %arg4[%29, %c0_32, %c0_33] : memref<1x1x16xf32, #tpu.memory_space<vmem>>, vector<1x1x16xf32>
    %31 = vector.shape_cast %30 : vector<1x1x16xf32> to vector<1x16xf32>
    %32 = vector.broadcast %31 : vector<1x16xf32> to vector<256x16xf32>
    %33 = arith.addf %28, %32 : vector<256x16xf32>
    %34 = arith.truncf %33 : vector<256x16xf32> to vector<256x16xbf16>
    %c0_34 = arith.constant 0 : index
    %c0_35 = arith.constant 0 : index
    %c0_36 = arith.constant 0 : index
    %35 = vector.load %arg5[%c0_34, %c0_35, %c0_36] : memref<1x256x16xbf16, #tpu.memory_space<vmem>>, vector<1x256x16xbf16>
    %36 = vector.shape_cast %35 : vector<1x256x16xbf16> to vector<256x16xbf16>
    %37 = vector.shape_cast %34 : vector<256x16xbf16> to vector<1x256x16xbf16>
    tpu.vector_store %arg5[%c0_34, %c0_35, %c0_36], %37 {strides = array<i32>} : memref<1x256x16xbf16, #tpu.memory_space<vmem>>, vector<1x256x16xbf16>,
    return
  }
  func.func @transform_0(%arg0: i32, %arg1: i32) -> (i32, i32, i32, i32) {
    %c0_i32 = arith.constant 0 : i32
    %c0_i32_0 = arith.constant 0 : i32
    %c0_i32_1 = arith.constant 0 : i32
    %c0_i32_2 = arith.constant 0 : i32
    return %arg0, %c0_i32, %c0_i32_0, %c0_i32_1 : i32, i32, i32, i32
  }
  func.func @transform_1(%arg0: i32, %arg1: i32) -> (i32, i32, i32, i32) {
    %c0_i32 = arith.constant 0 : i32
    %c0_i32_0 = arith.constant 0 : i32
    %c0_i32_1 = arith.constant 0 : i32
    %c0_i32_2 = arith.constant 0 : i32
    %c0_i32_3 = arith.constant 0 : i32
    return %c0_i32, %c0_i32_0, %c0_i32_1, %c0_i32_2 : i32, i32, i32, i32
  }
  func.func @transform_2(%arg0: i32, %arg1: i32) -> (i32, i32, i32) {
    %c0_i32 = arith.constant 0 : i32
    %c0_i32_0 = arith.constant 0 : i32
    %c0_i32_1 = arith.constant 0 : i32
    %c0_i32_2 = arith.constant 0 : i32
    return %c0_i32, %c0_i32_0, %c0_i32_1 : i32, i32, i32
  }
  func.func @transform_3(%arg0: i32, %arg1: i32) -> (i32, i32, i32) {
    %c0_i32 = arith.constant 0 : i32
    %c0_i32_0 = arith.constant 0 : i32
    return %arg0, %c0_i32, %arg1 : i32, i32, i32
  }
}

</mosaic_0001>

<bundles_post_ra>
// kernel: tpu_custom_call.1
= control target key start
LH: loop header
LB: loop body
LE: loop exit
PB: predicated region body
PF: predicated region fallthrough
CT: control target
= control target key end

     0   :  { %8 = vsyncpa [#allocation4], 0  ;;  %s3139_s0 = inlined_call_operand.hbm [shape: bf16[2,18,16,96], index: 0, kind: input, shape index: {}]   ;;  %s3140_s1 = inlined_call_operand.vmem [shape: bf16[1,3,96,16], index: 1, kind: input, shape index: {}]   ;;  %s3141_s2 = inlined_call_operand.vmem [shape: f32[1,1,16], index: 2, kind: input, shape index: {}]   ;;  %s3142_s3 = inlined_call_operand.vmem [shape: bf16[2,256,16], index: 3, kind: output, shape index: {}]  }
   0x1   :  { %10 = vsyncpa [#allocation4 + $0x1], 0  ;;  %s2608_s12 = smov 0   ;;  %s2610_s13 = smov 0  }
   0x2   :  { %s2612_s14 = smov 0   ;;  %s2614_s15 = smov 0  }
   0x3   :  { %s2616_s16 = smov 0   ;;  %s2618_s17 = smov 0  }
   0x4 LB: > { %s1889_s18 = sadd.s32 4294967295, %s2583_s17   ;;  %s28_s19 = sadd.s32 1, %s2579_s16  ;;  %s2583_s17 = sphi %s2618_s17, %s16_s17   ;;  %s2579_s16 = sphi %s2616_s16, %s3149_s16   ;;  %s2575_s15 = sphi %s2614_s15, %s3148_s15   ;;  %s2571_s14 = sphi %s2612_s14, %s3147_s14   ;;  %s2567_s13 = sphi %s2610_s13, %s3146_s13   ;;  %s2563_s12 = sphi %s2608_s12, %s3145_s12  }
   0x5   : > { %p30_p0 = scmp.ge.s32.totalorder %s28_s19, 2  ;;  %s35_s20 = sadd.s32 1, %s2571_s14 }
   0x6   : > { %p42_p1 = scmp.ne.s32.totalorder %s2571_s14, %s2567_s13  ;;  %p43_p2 = scmp.eq.s32.totalorder %s2583_s17, 0 }
   0x7   : > { %s3151_s19 = smov (%p30_p0, %s28_s19), 0  ;;  %p48_p4 = scmp.ne.s32.totalorder %s2567_s13, %s2563_s12 }
   0x8   : > { %p44_p3 = por %p43_p2, %p42_p1  ;;  %s32_s21 = ssub.s32 %s2579_s16, %s3151_s19 }
   0x9   : > { %p49_p5 = scmp.eq.s32.totalorder %s1889_s18, 0  ;;  %p33_p6 = scmp.eq.s32.totalorder %s32_s21, 0 }
   0xa   : > { %p2386_p8 = scmp.lt.s32.totalorder %s2583_s17, 2  ;;  %s148_s24 = sand.u32 1, %s2571_s14  }
   0xb   : > { %p2647_p7 = por %p49_p5, %p48_p4  ;;  %s2378_s25 = smul.u32 2304, %s2579_s16 }
   0xc   : > { %s2653_s23 = scalar_select %p33_p6, %s2571_s14, %s35_s20  }
   0xd   : > { %s2377_s26 = smul.u32 144, %s148_s24  ;;  %s2660_s29 = scalar_lea.hbm %s3139_s0, %s2378_s25 }
   0xe   : > { %p2662_p9 = pnand %p2386_p8, %p44_p3  ;;  %s2668_s6 = scalar_lea.sflag [#allocation4], %s148_s24 }
   0xf   : > { %s152_s4 = scalar_lea.vmem [#allocation3], %s2377_s26  ;;  %s2503_s7 = scalar_lea.hbm %s2660_s29, 2304 }
  0x10   : > { %s159_s5 = sshll.u32 %s152_s4, 4  ;;  %p2504_p10 = scmp.ne.s32.totalorder %s2660_s29, %s2503_s7  ;;  %s2666_s5 = int_to_ptr.vmem [resolvable:$true] %s159_s5 }
  0x11   : > { %p2505_p11 = pneg %p2662_p9  ;;  %s2508_s10 = scalar_lea.hbm %s3139_s0, 4608 }
  0x12   : > { %p2509_p0 = scmp.lt.u32.totalorder %s2660_s29, %s3139_s0  ;;  %p2510_p1 = scmp.lt.u32.totalorder %s2508_s10, %s2503_s7 }
  0x13   : > { %p2506_p12 = pnand %p2505_p11, %p2504_p10  ;;  %p2512_p3 = scmp.lt.u32.totalorder %s2503_s7, %s2660_s29 }
  0x14   : > { %p2511_p2 = por %p2510_p1, %p2509_p0 }
  0x15   : > { %p2507_p13 = pneg %p2506_p12 }
  0x16   : > { %p2513_p4 = por %p2512_p3, %p2511_p2 }
  0x18   : > { %p2514_p5 = pnand %p2513_p4, %p2507_p13 }
  0x1a   : > { %2517 = shalt.err (!%p2514_p5)
}
  0x1b   : > { %s2518_s18 = scalar_lea.vmem %s2666_s5, 2304  ;;  %s2585_s20 = smov [#allocation3]  }
  0x1c   : > { %p2519_p6 = scmp.ne.s32.totalorder %s2666_s5, %s2518_s18  ;;  %s2523_s21 = sshll.u32 %s2585_s20, 4  ;;  %s2524_s21 = int_to_ptr.vmem [resolvable:$false] %s2523_s21 }
  0x1d   : > { %s2525_s24 = scalar_lea.vmem %s2524_s21, 4608  ;;  %p2526_p12 = scmp.lt.s32.totalorder %s2666_s5, %s2524_s21 }
  0x1e   : > { %p2521_p8 = pnand %p2519_p6, %p2505_p11  ;;  %p2527_p0 = scmp.lt.s32.totalorder %s2525_s24, %s2518_s18 }
  0x20   : > { %p2522_p10 = pneg %p2521_p8  ;;  %p2528_p1 = por %p2527_p0, %p2526_p12 }
  0x22   : > { %p2529_p2 = pnand %p2528_p1, %p2522_p10 }
  0x24   : > { %2532 = shalt.err (!%p2529_p2)
}
  0x25   : > { %s2586_s25 = smov 64   ;;  %s2587_s26 = smov 4  }
  0x26   : > { %2385 = dma.hbm_to_vmem [thread:$0]  (!%p2662_p9), %s2660_s29, 2304, %s2666_s5, %s2668_s6, %s2586_s25, %s2586_s25, %s2587_s26  }
  0x27   : > { %p1894_p11 = scmp.ge.s32.totalorder %s2583_s17, 1  ;;  %p167_p13 = scmp.lt.s32.totalorder %s2583_s17, 3 }
  0x29   : > { %p168_p3 = pnand %p1894_p11, %p167_p13 }
  0x2a   : > { %s173_s27 = sand.u32 (!%p168_p3), 1, %s2567_s13  }
  0x2b   : > { %171 = sbr.rel (%p168_p3) target bundleno = 406 (0x196), region = 32  ;;  %s174_s4 = scalar_lea.sflag (!%p168_p3), [#allocation4], %s173_s27 }
  0x2c   : > { %s2379_s28 = smul.u32 (!%p168_p3), 144, %s173_s27 }
  0x2e   : > { %s2699_s7 = scalar_lea.vmem (!%p168_p3), [#allocation3], %s2379_s28 }
  0x32   : > { %2558 = dma.done.wait (%p2647_p7), %s174_s4, 2304  }
  0x33   : > { %2560 = vsyncadd (%p2647_p7), %s174_s4, 4294964992  ;;  %v2437_v0 = vld [vmem:[%s3140_s1] sm:$0xff]   ;;  %v2438_v1 = vld [vmem:[%s3140_s1 + $0x8] sm:$0xff]   ;;  %vm375_vm0 = vcmask 785408   ;;  %vm585_vm1 = vcmask 130048   ;;  %p203_p7 = scmp.lt.s32.totalorder %s2575_s15, 1 }
  0x34   : > { %2365 = vmatprep.subr.bf16.mxu1 %v2437_v0  ;;  %2233 = vmatprep.subr.bf16.mxu0 %v2437_v0  ;;  %v2439_v2 = vld [vmem:[%s3140_s1 + $0x10] sm:$0xff]   ;;  %v2440_v4 = vld [vmem:[%s3140_s1 + $0x18] sm:$0xff]   ;;  %v2441_v6 = vld [vmem:[%s3140_s1 + $0x20] sm:$0xff]   ;;  %vm1756_vm2 = vcmask 125952  }
  0x35   : > { %2371 = vmatpush3.bf16.msra.mxu1 %v2437_v0  ;;  %2234 = vmatpush3.bf16.msra.mxu0 %v2437_v0  ;;  %v2443_v3 = vld [vmem:[%s2699_s7 + $0x40] sm:$0xff]   ;;  %v2442_v7 = vld [vmem:[%s3140_s1 + $0x28] sm:$0xff]   ;;  %v2446_v11 = vld [vmem:[%s3140_s1 + $0x38] sm:$0xff]   ;;  %s3153_s15 = smov (!%p203_p7, %s2575_s15), 1 }
  0x36   : > { %2366 = vmatprep.subr.bf16.mxu1 %v2438_v1  ;;  %2235 = vmatprep.subr.bf16.mxu0 %v2438_v1  ;;  %v2447_v5 = vld [vmem:[%s2699_s7] sm:$0xff]   ;;  %v2444_v10 = vld [vmem:[%s2699_s7 + $0x48] sm:$0xff]   ;;  %v2448_v13 = vld [vmem:[%s2699_s7 + $0x50] sm:$0xff]   ;;  %s2134_s4 = sshll.u32 %s3153_s15, 7 }
  0x37   : > { %2261 = vmatprep.mubr.msk.bf16.mxu1 %vm375_vm0, %v2443_v3  ;;  %2245 = vmatprep.mubr.msk.bf16.mxu0 %vm375_vm0, %v2447_v5  ;;  %v2445_v8 = vld [vmem:[%s3140_s1 + $0x30] sm:$0xff]   ;;  %v2451_v9 = vld [vmem:[%s3140_s1 + $0x60] sm:$0xff]   ;;  %v2449_v12 = vld [vmem:[%s2699_s7 + $0x8] sm:$0xff]   ;;  %s2925_s9 = scalar_lea.vmem %s3142_s3, %s2134_s4 }
  0x38   : > { %v2453_v14 = vld [vmem:[%s2699_s7 + $0x10] sm:$0xff]   ;;  %v2458_v15 = vld [vmem:[%s3140_s1 + $0x68] sm:$0xff]   ;;  %v2454_v18 = vld [vmem:[%s2699_s7 + $0x60] sm:$0xff]  }
  0x39   : > { %2372 = vmatpush3.bf16.msra.mxu1 %v2438_v1  ;;  %2236 = vmatpush3.bf16.msra.mxu0 %v2438_v1  ;;  %v2450_v16 = vld [vmem:[%s2699_s7 + $0x58] sm:$0xff]   ;;  %v2452_v17 = vld [vmem:[%s3140_s1 + $0x40] sm:$0xff]   ;;  %v2459_v19 = vld [vmem:[%s3140_s1 + $0x70] sm:$0xff]  }
  0x3a   : > { %2367 = vmatprep.subr.bf16.mxu1 %v2439_v2  ;;  %2237 = vmatprep.subr.bf16.mxu0 %v2439_v2  ;;  %v2455_v20 = vld [vmem:[%s2699_s7 + $0x18] sm:$0xff]   ;;  %v2461_v22 = vld [vmem:[%s2699_s7 + $0x20] sm:$0xff]   ;;  %v2456_v24 = vld [vmem:[%s2699_s7 + $0x68] sm:$0xff]  }
  0x3b   : > { %v2457_v21 = vld [vmem:[%s3140_s1 + $0x48] sm:$0xff]   ;;  %v2465_v23 = vld [vmem:[%s3140_s1 + $0x78] sm:$0xff]   ;;  %v2460_v25 = vld [vmem:[%s3140_s1 + $0x50] sm:$0xff]  }
  0x3c   : > { %v2462_v26 = vld [vmem:[%s2699_s7 + $0x70] sm:$0xff]   ;;  %v2463_v28 = vld [vmem:[%s2699_s7 + $0x28] sm:$0xff]   ;;  %v2464_v32 = vld [vmem:[%s2699_s7 + $0x78] sm:$0xff]  }
  0x3d   : > { %2373 = vmatpush3.bf16.msra.mxu1 %v2439_v2  ;;  %2238 = vmatpush3.bf16.msra.mxu0 %v2439_v2  ;;  %v2471_v27 = vld [vmem:[%s3140_s1 + $0x80] sm:$0xff]   ;;  %v2466_v29 = vld [vmem:[%s3140_s1 + $0x58] sm:$0xff]   ;;  %v2472_v31 = vld [vmem:[%s3140_s1 + $0x88] sm:$0xff]  }
  0x3e   : > { %2368 = vmatprep.subr.bf16.mxu1 %v2440_v4  ;;  %2239 = vmatprep.subr.bf16.mxu0 %v2440_v4  ;;  %v2467_v30 = vld [vmem:[%s2699_s7 + $0x30] sm:$0xff]   ;;  %v2468_v33 = vld [vmem:[%s2699_s7 + $0x8] sm:$0xff]   ;;  %v2469_v34 = vld [vmem:[%s2699_s7 + $0x38] sm:$0xff]  }
  0x3f   : > { %v2474_v35 = vld [vmem:[%s2699_s7 + $0x10] sm:$0xff]   ;;  %v2473_v37 = vld [vmem:[%s2699_s7 + $0x18] sm:$0xff]   ;;  %v2478_v39 = vld [vmem:[%s2699_s7 + $0x20] sm:$0xff]  }
  0x40   : > { %v2470_v36 = vld [vmem:[%s2699_s7 + $0x10] sm:$0xff]   ;;  %v2476_v38 = vld [vmem:[%s2699_s7 + $0x18] sm:$0xff]   ;;  %v2475_v40 = vld [vmem:[%s2699_s7 + $0x20] sm:$0xff]  }
  0x41   : > { %2374 = vmatpush3.bf16.msra.mxu1 %v2440_v4  ;;  %2240 = vmatpush3.bf16.msra.mxu0 %v2440_v4  ;;  %v2477_v41 = vld [vmem:[%s2699_s7 + $0x28] sm:$0xff]   ;;  %v2482_v43 = vld [vmem:[%s2699_s7 + $0x30] sm:$0xff]   ;;  %v2484_v45 = vld [vmem:[%s2699_s7 + $0x38] sm:$0xff]  }
  0x42   : > { %2369 = vmatprep.subr.bf16.mxu1 %v2441_v6  ;;  %2241 = vmatprep.subr.bf16.mxu0 %v2441_v6  ;;  %v2480_v42 = vld [vmem:[%s2699_s7 + $0x28] sm:$0xff]   ;;  %v2479_v44 = vld [vmem:[%s2699_s7 + $0x30] sm:$0xff]   ;;  %v2481_v46 = vld [vmem:[%s2699_s7 + $0x38] sm:$0xff]  }
  0x43   : > { %v2486_v47 = vld [vmem:[%s2699_s7 + $0x40] sm:$0xff]   ;;  %v2488_v49 = vld [vmem:[%s2699_s7 + $0x48] sm:$0xff]   ;;  %v2490_v51 = vld [vmem:[%s2699_s7 + $0x50] sm:$0xff]  }
  0x44   : > { %v2483_v48 = vld [vmem:[%s2699_s7 + $0x40] sm:$0xff]   ;;  %v2485_v50 = vld [vmem:[%s2699_s7 + $0x48] sm:$0xff]   ;;  %v2487_v52 = vld [vmem:[%s2699_s7 + $0x50] sm:$0xff]  }
  0x45   : > { %2375 = vmatpush3.bf16.msra.mxu1 %v2441_v6  ;;  %2242 = vmatpush3.bf16.msra.mxu0 %v2441_v6  ;;  %v2492_v53 = vld [vmem:[%s2699_s7 + $0x58] sm:$0xff]   ;;  %v2494_v55 = vld [vmem:[%s2699_s7 + $0x60] sm:$0xff]   ;;  %v2496_v57 = vld [vmem:[%s2699_s7 + $0x68] sm:$0xff]  }
  0x46   : > { %2370 = vmatprep.subr.bf16.mxu1 %v2442_v7  ;;  %2243 = vmatprep.subr.bf16.mxu0 %v2442_v7  ;;  %v2489_v54 = vld [vmem:[%s2699_s7 + $0x58] sm:$0xff]   ;;  %v2491_v56 = vld [vmem:[%s2699_s7 + $0x60] sm:$0xff]   ;;  %v2493_v58 = vld [vmem:[%s2699_s7 + $0x68] sm:$0xff]  }
  0x47   : > { %v2498_v59 = vld [vmem:[%s2699_s7 + $0x70] sm:$0xff]   ;;  %v2500_v61 = vld [vmem:[%s2699_s7 + $0x78] sm:$0xff]   ;;  %v2501_v63 = vld [vmem:[%s2699_s7 + $0x80] sm:$0xff]  }
  0x48   : > { %v2495_v60 = vld [vmem:[%s2699_s7 + $0x70] sm:$0xff]   ;;  %v2497_v62 = vld [vmem:[%s2699_s7 + $0x78] sm:$0xff]   ;;  %v2499_v0 = vld [vmem:[%s2699_s7 + $0x80] sm:$0xff]  }
  0x49   : > { %2376 = vmatpush3.bf16.msra.mxu1 %v2442_v7  ;;  %2244 = vmatpush3.bf16.msra.mxu0 %v2442_v7  ;;  %v2502_v1 = vld [vmem:[%s2699_s7 + $0x88] sm:$0xff]  }
  0x4a   : > { %2277 = vmatprep.subr.bf16.mxu1 %v2445_v8  ;;  %2321 = vmatprep.subr.bf16.mxu0 %v2451_v9 }
  0x4c   : > { %2262 = vmatmul.mubr.msk.bf16.vlgmr.msra.gmra.mrb[0].mxu1 %vm375_vm0, %v2444_v10  ;;  %2246 = vmatmul.mubr.msk.bf16.vlgmr.msra.gmra.mrb[0].mxu0 %vm375_vm0, %v2449_v12 }
  0x4d   : > { %2278 = vmatpush3.bf16.msra.mxu1 %v2445_v8  ;;  %2265 = vmatprep.mubr.msk.bf16.mxu1 %vm375_vm0, %v2448_v13 }
  0x4e   : > { %2279 = vmatprep.subr.bf16.mxu1 %v2446_v11  ;;  %2322 = vmatpush3.bf16.msra.mxu0 %v2451_v9 }
  0x4f   : > { %2249 = vmatprep.mubr.msk.bf16.mxu0 %vm375_vm0, %v2453_v14  ;;  %2323 = vmatprep.subr.bf16.mxu0 %v2458_v15 }
  0x51   : > { %2280 = vmatpush3.bf16.msra.mxu1 %v2446_v11 }
  0x52   : > { %2281 = vmatprep.subr.bf16.mxu1 %v2452_v17  ;;  %2324 = vmatpush3.bf16.msra.mxu0 %v2458_v15 }
  0x53   : > { %2325 = vmatprep.subr.bf16.mxu0 %v2459_v19 }
  0x54   : > { %2266 = vmatmul.mubr.msk.bf16.gmra.mrb[4].mxu1 %vm375_vm0, %v2450_v16  ;;  %2250 = vmatmul.mubr.msk.bf16.gmra.mrb[4].mxu0 %vm375_vm0, %v2455_v20 }
  0x55   : > { %2282 = vmatpush3.bf16.msra.mxu1 %v2452_v17  ;;  %2269 = vmatprep.mubr.msk.bf16.mxu1 %vm375_vm0, %v2454_v18 }
  0x56   : > { %2283 = vmatprep.subr.bf16.mxu1 %v2457_v21  ;;  %2326 = vmatpush3.bf16.msra.mxu0 %v2459_v19 }
  0x57   : > { %2253 = vmatprep.mubr.msk.bf16.mxu0 %vm375_vm0, %v2461_v22  ;;  %2327 = vmatprep.subr.bf16.mxu0 %v2465_v23 }
  0x59   : > { %2284 = vmatpush3.bf16.msra.mxu1 %v2457_v21 }
  0x5a   : > { %2285 = vmatprep.subr.bf16.mxu1 %v2460_v25  ;;  %2328 = vmatpush3.bf16.msra.mxu0 %v2465_v23 }
  0x5b   : > { %2329 = vmatprep.subr.bf16.mxu0 %v2471_v27 }
  0x5c   : > { %2270 = vmatmul.mubr.msk.bf16.gmra.mrb[8].mxu1 %vm375_vm0, %v2456_v24  ;;  %2254 = vmatmul.mubr.msk.bf16.gmra.mrb[8].mxu0 %vm375_vm0, %v2463_v28 }
  0x5d   : > { %2273 = vmatprep.mubr.msk.bf16.mxu1 %vm375_vm0, %v2462_v26  ;;  %2286 = vmatpush3.bf16.msra.mxu1 %v2460_v25 }
  0x5e   : > { %2287 = vmatprep.subr.bf16.mxu1 %v2466_v29  ;;  %2257 = vmatprep.mubr.msk.bf16.mxu0 %vm375_vm0, %v2467_v30 }
  0x5f   : > { %2330 = vmatpush3.bf16.msra.mxu0 %v2471_v27 }
  0x60   : > { %2331 = vmatprep.subr.bf16.mxu0 %v2472_v31 }
  0x61   : > { %2288 = vmatpush3.bf16.msra.mxu1 %v2466_v29 }
  0x63   : > { %2332 = vmatpush3.bf16.msra.mxu0 %v2472_v31 }
  0x64   : > { %2274 = vmatmul.mubr.msk.bf16.gmra.mrb[12].mxu1 %vm375_vm0, %v2464_v32  ;;  %2258 = vmatmul.mubr.msk.bf16.gmra.mrb[12].mxu0 %vm375_vm0, %v2469_v34 }
  0x65   : > { %2289 = vmatprep.mubr.msk.bf16.mxu1 %vm375_vm0, %v2468_v33  ;;  %2333 = vmatprep.mubr.msk.bf16.mxu0 %vm375_vm0, %v2474_v35 }
  0x6c   : > { %2290 = vmatmul.mubr.msk.bf16.vlgmr.msra.gmra.mrb[16].mxu1 %vm375_vm0, %v2470_v36  ;;  %2334 = vmatmul.mubr.msk.bf16.vlgmr.msra.gmra.mrb[16].mxu0 %vm375_vm0, %v2476_v38 }
  0x6d   : > { %2293 = vmatprep.mubr.msk.bf16.mxu1 %vm375_vm0, %v2473_v37  ;;  %2337 = vmatprep.mubr.msk.bf16.mxu0 %vm375_vm0, %v2478_v39 }
  0x74   : > { %2294 = vmatmul.mubr.msk.bf16.gmra.mrb[20].mxu1 %vm375_vm0, %v2475_v40  ;;  %2338 = vmatmul.mubr.msk.bf16.gmra.mrb[20].mxu0 %vm375_vm0, %v2480_v42 }
  0x75   : > { %2297 = vmatprep.mubr.msk.bf16.mxu1 %vm375_vm0, %v2477_v41  ;;  %2341 = vmatprep.mubr.msk.bf16.mxu0 %vm375_vm0, %v2482_v43 }
  0x7c   : > { %2298 = vmatmul.mubr.msk.bf16.gmra.mrb[24].mxu1 %vm375_vm0, %v2479_v44  ;;  %2342 = vmatmul.mubr.msk.bf16.gmra.mrb[24].mxu0 %vm375_vm0, %v2484_v45 }
  0x7d   : > { %2301 = vmatprep.mubr.msk.bf16.mxu1 %vm375_vm0, %v2481_v46  ;;  %2345 = vmatprep.mubr.msk.bf16.mxu0 %vm375_vm0, %v2486_v47 }
  0x84   : > { %2302 = vmatmul.mubr.msk.bf16.gmra.mrb[28].mxu1 %vm375_vm0, %v2483_v48  ;;  %2346 = vmatmul.mubr.msk.bf16.gmra.mrb[28].mxu0 %vm375_vm0, %v2488_v49 }
  0x85   : > { %2305 = vmatprep.mubr.msk.bf16.mxu1 %vm375_vm0, %v2485_v50  ;;  %2349 = vmatprep.mubr.msk.bf16.mxu0 %vm375_vm0, %v2490_v51 }
  0x8c   : > { %2306 = vmatmul.mubr.msk.bf16.gmra.mrb[32].mxu1 %vm375_vm0, %v2487_v52  ;;  %2350 = vmatmul.mubr.msk.bf16.gmra.mrb[32].mxu0 %vm375_vm0, %v2492_v53 }
  0x8d   : > { %2309 = vmatprep.mubr.msk.bf16.mxu1 %vm375_vm0, %v2489_v54  ;;  %2353 = vmatprep.mubr.msk.bf16.mxu0 %vm375_vm0, %v2494_v55 }
  0x94   : > { %2310 = vmatmul.mubr.msk.bf16.gmra.mrb[36].mxu1 %vm375_vm0, %v2491_v56  ;;  %2354 = vmatmul.mubr.msk.bf16.gmra.mrb[36].mxu0 %vm375_vm0, %v2496_v57 }
  0x95   : > { %2313 = vmatprep.mubr.msk.bf16.mxu1 %vm375_vm0, %v2493_v58  ;;  %2357 = vmatprep.mubr.msk.bf16.mxu0 %vm375_vm0, %v2498_v59 }
  0x9c   : > { %2314 = vmatmul.mubr.msk.bf16.gmra.mrb[40].mxu1 %vm375_vm0, %v2495_v60  ;;  %2358 = vmatmul.mubr.msk.bf16.gmra.mrb[40].mxu0 %vm375_vm0, %v2500_v61 }
  0x9d   : > { %2317 = vmatprep.mubr.msk.bf16.mxu1 %vm375_vm0, %v2497_v62  ;;  %2361 = vmatprep.mubr.msk.bf16.mxu0 %vm375_vm0, %v2501_v63 }
  0xa4   : > { %2318 = vmatmul.mubr.msk.bf16.gmra.mrb[44].mxu1 %vm375_vm0, %v2499_v0  ;;  %2362 = vmatmul.mubr.msk.bf16.gmra.mrb[44].mxu0 %vm375_vm0, %v2502_v1 }
 0x11f   : > { %v2263_v2 = vpop.f32.mrb[0].mxu1  ;;  %v2247_v3 = vpop.f32.mrb[0].mxu0 }
 0x120   : > { %604 = vst.msk [vmem:[#allocation2 + $0x90] sm:$0xff] %vm585_vm1, %v2263_v2  ;;  %v522_v4 = vpop.f32.mrb[1].mxu1  ;;  %588 = vst.msk [vmem:[#allocation2 + $0x10] sm:$0xff] %vm585_vm1, %v2247_v3  ;;  %v458_v5 = vpop.f32.mrb[1].mxu0 }
 0x121   : > { %602 = vst.msk [vmem:[#allocation2 + $0x80] sm:$0xff] %vm585_vm1, %v522_v4  ;;  %v2264_v6 = vpop.f32.mrb[2].mxu1  ;;  %586 = vst.msk [vmem:[#allocation2] sm:$0xff] %vm585_vm1, %v458_v5  ;;  %v2248_v7 = vpop.f32.mrb[2].mxu0 }
 0x122   : > { %605 = vst.msk [vmem:[#allocation2 + $0x98] sm:$0xff] %vm585_vm1, %v2264_v6  ;;  %v525_v8 = vpop.f32.mrb[3].mxu1  ;;  %589 = vst.msk [vmem:[#allocation2 + $0x18] sm:$0xff] %vm585_vm1, %v2248_v7  ;;  %v461_v9 = vpop.f32.mrb[3].mxu0 }
 0x123   : > { %603 = vst.msk [vmem:[#allocation2 + $0x88] sm:$0xff] %vm585_vm1, %v525_v8  ;;  %587 = vst.msk [vmem:[#allocation2 + $0x8] sm:$0xff] %vm585_vm1, %v461_v9 }
 0x127   : > { %v2267_v10 = vpop.f32.mrb[4].mxu1  ;;  %v2251_v11 = vpop.f32.mrb[4].mxu0  ;;  %v993_v35 = vld [vmem:[#allocation2 + $0x10] sm:$0xff] }
 0x128   : > { %608 = vst.msk [vmem:[#allocation2 + $0xb0] sm:$0xff] %vm585_vm1, %v2267_v10  ;;  %v538_v12 = vpop.f32.mrb[5].mxu1  ;;  %592 = vst.msk [vmem:[#allocation2 + $0x30] sm:$0xff] %vm585_vm1, %v2251_v11  ;;  %v474_v13 = vpop.f32.mrb[5].mxu0  ;;  %v991_v39 = vld [vmem:[#allocation2] sm:$0xff] }
 0x129   : > { %606 = vst.msk [vmem:[#allocation2 + $0xa0] sm:$0xff] %vm585_vm1, %v538_v12  ;;  %v2268_v14 = vpop.f32.mrb[6].mxu1  ;;  %590 = vst.msk [vmem:[#allocation2 + $0x20] sm:$0xff] %vm585_vm1, %v474_v13  ;;  %v2252_v15 = vpop.f32.mrb[6].mxu0  ;;  %v994_v43 = vld [vmem:[#allocation2 + $0x18] sm:$0xff] }
 0x12a   : > { %609 = vst.msk [vmem:[#allocation2 + $0xb8] sm:$0xff] %vm585_vm1, %v2268_v14  ;;  %v541_v16 = vpop.f32.mrb[7].mxu1  ;;  %593 = vst.msk [vmem:[#allocation2 + $0x38] sm:$0xff] %vm585_vm1, %v2252_v15  ;;  %v477_v17 = vpop.f32.mrb[7].mxu0  ;;  %v992_v47 = vld [vmem:[#allocation2 + $0x8] sm:$0xff] }
 0x12b   : > { %607 = vst.msk [vmem:[#allocation2 + $0xa8] sm:$0xff] %vm585_vm1, %v541_v16  ;;  %591 = vst.msk [vmem:[#allocation2 + $0x28] sm:$0xff] %vm585_vm1, %v477_v17  ;;  %v2910_v17 = vld [vmem:[%s3141_s2] ss:$0 sm:$0xff] }
 0x12f   : > { %v2271_v18 = vpop.f32.mrb[8].mxu1  ;;  %v2255_v19 = vpop.f32.mrb[8].mxu0  ;;  %v997_v51 = vld [vmem:[#allocation2 + $0x30] sm:$0xff] }
 0x130   : > { %612 = vst.msk [vmem:[#allocation2 + $0xd0] sm:$0xff] %vm585_vm1, %v2271_v18  ;;  %v554_v20 = vpop.f32.mrb[9].mxu1  ;;  %596 = vst.msk [vmem:[#allocation2 + $0x50] sm:$0xff] %vm585_vm1, %v2255_v19  ;;  %v490_v21 = vpop.f32.mrb[9].mxu0  ;;  %v995_v55 = vld [vmem:[#allocation2 + $0x20] sm:$0xff] }
 0x131   : > { %610 = vst.msk [vmem:[#allocation2 + $0xc0] sm:$0xff] %vm585_vm1, %v554_v20  ;;  %v2272_v22 = vpop.f32.mrb[10].mxu1  ;;  %594 = vst.msk [vmem:[#allocation2 + $0x40] sm:$0xff] %vm585_vm1, %v490_v21  ;;  %v2256_v23 = vpop.f32.mrb[10].mxu0  ;;  %v998_v60 = vld [vmem:[#allocation2 + $0x38] sm:$0xff] }
 0x132   : > { %613 = vst.msk [vmem:[#allocation2 + $0xd8] sm:$0xff] %vm585_vm1, %v2272_v22  ;;  %v557_v24 = vpop.f32.mrb[11].mxu1  ;;  %597 = vst.msk [vmem:[#allocation2 + $0x58] sm:$0xff] %vm585_vm1, %v2256_v23  ;;  %v493_v25 = vpop.f32.mrb[11].mxu0  ;;  %v996_v2 = vld [vmem:[#allocation2 + $0x28] sm:$0xff] }
 0x133   : > { %611 = vst.msk [vmem:[#allocation2 + $0xc8] sm:$0xff] %vm585_vm1, %v557_v24  ;;  %595 = vst.msk [vmem:[#allocation2 + $0x48] sm:$0xff] %vm585_vm1, %v493_v25 }
 0x137   : > { %v2275_v26 = vpop.f32.mrb[12].mxu1  ;;  %v2259_v27 = vpop.f32.mrb[12].mxu0  ;;  %v1001_v11 = vld [vmem:[#allocation2 + $0x50] sm:$0xff] }
 0x138   : > { %616 = vst.msk [vmem:[#allocation2 + $0xf0] sm:$0xff] %vm585_vm1, %v2275_v26  ;;  %v570_v28 = vpop.f32.mrb[13].mxu1  ;;  %600 = vst.msk [vmem:[#allocation2 + $0x70] sm:$0xff] %vm585_vm1, %v2259_v27  ;;  %v506_v29 = vpop.f32.mrb[13].mxu0  ;;  %v999_v15 = vld [vmem:[#allocation2 + $0x40] sm:$0xff] }
 0x139   : > { %614 = vst.msk [vmem:[#allocation2 + $0xe0] sm:$0xff] %vm585_vm1, %v570_v28  ;;  %v2276_v30 = vpop.f32.mrb[14].mxu1  ;;  %598 = vst.msk [vmem:[#allocation2 + $0x60] sm:$0xff] %vm585_vm1, %v506_v29  ;;  %v2260_v31 = vpop.f32.mrb[14].mxu0  ;;  %v1002_v21 = vld [vmem:[#allocation2 + $0x58] sm:$0xff] }
 0x13a   : > { %617 = vst.msk [vmem:[#allocation2 + $0xf8] sm:$0xff] %vm585_vm1, %v2276_v30  ;;  %v573_v32 = vpop.f32.mrb[15].mxu1  ;;  %601 = vst.msk [vmem:[#allocation2 + $0x78] sm:$0xff] %vm585_vm1, %v2260_v31  ;;  %v509_v33 = vpop.f32.mrb[15].mxu0  ;;  %v1000_v27 = vld [vmem:[#allocation2 + $0x48] sm:$0xff] }
 0x13b   : > { %615 = vst.msk [vmem:[#allocation2 + $0xe8] sm:$0xff] %vm585_vm1, %v573_v32  ;;  %599 = vst.msk [vmem:[#allocation2 + $0x68] sm:$0xff] %vm585_vm1, %v509_v33 }
 0x13f   : > { %v2291_v34 = vpop.f32.mrb[16].mxu1  ;;  %v2335_v36 = vpop.f32.mrb[16].mxu0 }
 0x140   : > { %v1025_v37 = vadd.f32 %v2291_v34, %v993_v35  ;;  %v864_v38 = vpop.f32.mrb[17].mxu1  ;;  %v1333_v40 = vpop.f32.mrb[17].mxu0 }
 0x141   : > { %v1023_v41 = vadd.f32 %v991_v39, %v864_v38  ;;  %v2292_v42 = vpop.f32.mrb[18].mxu1  ;;  %v2336_v44 = vpop.f32.mrb[18].mxu0 }
 0x142   : > { %1057 = vst.msk [vmem:[#allocation2 + $0x10] sm:$0xff] %vm585_vm1, %v1025_v37  ;;  %v1026_v45 = vadd.f32 %v2292_v42, %v994_v43  ;;  %v867_v46 = vpop.f32.mrb[19].mxu1  ;;  %v1336_v48 = vpop.f32.mrb[19].mxu0 }
 0x143   : > { %1055 = vst.msk [vmem:[#allocation2] sm:$0xff] %vm585_vm1, %v1023_v41  ;;  %v1024_v49 = vadd.f32 %v992_v47, %v867_v46  ;;  %v1005_v46 = vld [vmem:[#allocation2 + $0x70] sm:$0xff] }
 0x144   : > { %1058 = vst.msk [vmem:[#allocation2 + $0x18] sm:$0xff] %vm585_vm1, %v1026_v45 }
 0x145   : > { %1056 = vst.msk [vmem:[#allocation2 + $0x8] sm:$0xff] %vm585_vm1, %v1024_v49 }
 0x147   : > { %v2295_v50 = vpop.f32.mrb[20].mxu1  ;;  %v2339_v52 = vpop.f32.mrb[20].mxu0 }
 0x148   : > { %v1029_v53 = vadd.f32 %v2295_v50, %v997_v51  ;;  %v880_v54 = vpop.f32.mrb[21].mxu1  ;;  %v1349_v56 = vpop.f32.mrb[21].mxu0  ;;  %v1003_v51 = vld [vmem:[#allocation2 + $0x60] sm:$0xff] }
 0x149   : > { %v1462_v57 = vld [vmem:[#allocation2 + $0x10] sm:$0xff]  ;;  %v1027_v58 = vadd.f32 %v995_v55, %v880_v54  ;;  %v2296_v59 = vpop.f32.mrb[22].mxu1  ;;  %v2340_v61 = vpop.f32.mrb[22].mxu0 }
 0x14a   : > { %1061 = vst.msk [vmem:[#allocation2 + $0x30] sm:$0xff] %vm585_vm1, %v1029_v53  ;;  %v1494_v62 = vadd.f32 %v2335_v36, %v1462_v57  ;;  %v1460_v63 = vld [vmem:[#allocation2] sm:$0xff]  ;;  %v1030_v0 = vadd.f32 %v2296_v59, %v998_v60  ;;  %v883_v1 = vpop.f32.mrb[23].mxu1  ;;  %v1352_v3 = vpop.f32.mrb[23].mxu0  ;;  %v1006_v57 = vld [vmem:[#allocation2 + $0x78] sm:$0xff] }
 0x14b   : > { %1059 = vst.msk [vmem:[#allocation2 + $0x20] sm:$0xff] %vm585_vm1, %v1027_v58  ;;  %v1492_v4 = vadd.f32 %v1460_v63, %v1333_v40  ;;  %v1463_v5 = vld [vmem:[#allocation2 + $0x18] sm:$0xff]  ;;  %v1028_v6 = vadd.f32 %v996_v2, %v883_v1  ;;  %v1004_v63 = vld [vmem:[#allocation2 + $0x68] sm:$0xff] }
 0x14c   : > { %1526 = vst.msk [vmem:[#allocation2 + $0x10] sm:$0xff] %vm585_vm1, %v1494_v62  ;;  %1062 = vst.msk [vmem:[#allocation2 + $0x38] sm:$0xff] %vm585_vm1, %v1030_v0  ;;  %v1495_v7 = vadd.f32 %v2336_v44, %v1463_v5  ;;  %v1461_v8 = vld [vmem:[#allocation2 + $0x8] sm:$0xff] }
 0x14d   : > { %1524 = vst.msk [vmem:[#allocation2] sm:$0xff] %vm585_vm1, %v1492_v4  ;;  %1060 = vst.msk [vmem:[#allocation2 + $0x28] sm:$0xff] %vm585_vm1, %v1028_v6  ;;  %v1493_v9 = vadd.f32 %v1461_v8, %v1336_v48 }
 0x14e   : > { %1527 = vst.msk [vmem:[#allocation2 + $0x18] sm:$0xff] %vm585_vm1, %v1495_v7 }
 0x14f   : > { %1525 = vst.msk [vmem:[#allocation2 + $0x8] sm:$0xff] %vm585_vm1, %v1493_v9  ;;  %v2299_v10 = vpop.f32.mrb[24].mxu1  ;;  %v2343_v12 = vpop.f32.mrb[24].mxu0 }
 0x150   : > { %v1033_v13 = vadd.f32 %v2299_v10, %v1001_v11  ;;  %v896_v14 = vpop.f32.mrb[25].mxu1  ;;  %v2905_v16 = vpop.f32.mrb[25].mxu0 }
 0x151   : > { %v1466_v18 = vld [vmem:[#allocation2 + $0x30] sm:$0xff]  ;;  %v1031_v19 = vadd.f32 %v999_v15, %v896_v14  ;;  %v2300_v20 = vpop.f32.mrb[26].mxu1  ;;  %v2912_v22 = vpop.f32.mrb[26].mxu0 }
 0x152   : > { %1065 = vst.msk [vmem:[#allocation2 + $0x50] sm:$0xff] %vm585_vm1, %v1033_v13  ;;  %v1498_v23 = vadd.f32 %v2339_v52, %v1466_v18  ;;  %v1464_v24 = vld [vmem:[#allocation2 + $0x20] sm:$0xff]  ;;  %v1034_v25 = vadd.f32 %v2300_v20, %v1002_v21  ;;  %v899_v26 = vpop.f32.mrb[27].mxu1  ;;  %v2916_v28 = vpop.f32.mrb[27].mxu0 }
 0x153   : > { %v1558_v29 = vld [vmem:[#allocation2 + $0x10] sm:$0xff]  ;;  %1063 = vst.msk [vmem:[#allocation2 + $0x40] sm:$0xff] %vm585_vm1, %v1031_v19  ;;  %v1496_v30 = vadd.f32 %v1464_v24, %v1349_v56  ;;  %v1467_v31 = vld [vmem:[#allocation2 + $0x38] sm:$0xff]  ;;  %v1032_v32 = vadd.f32 %v1000_v27, %v899_v26  ;;  %v1007_v24 = vld [vmem:[#allocation2 + $0x80] sm:$0xff] }
 0x154   : > { %v1598_v33 = vadd.f32 %v2910_v17, %v1558_v29  ;;  %v1556_v34 = vld [vmem:[#allocation2] sm:$0xff]  ;;  %1530 = vst.msk [vmem:[#allocation2 + $0x30] sm:$0xff] %vm585_vm1, %v1498_v23  ;;  %1066 = vst.msk [vmem:[#allocation2 + $0x58] sm:$0xff] %vm585_vm1, %v1034_v25  ;;  %v1499_v35 = vadd.f32 %v2340_v61, %v1467_v31  ;;  %v1465_v36 = vld [vmem:[#allocation2 + $0x28] sm:$0xff] }
 0x155   : > { %v1596_v37 = vadd.f32 %v2910_v17, %v1556_v34  ;;  %v1559_v38 = vld [vmem:[#allocation2 + $0x18] sm:$0xff]  ;;  %1528 = vst.msk [vmem:[#allocation2 + $0x20] sm:$0xff] %vm585_vm1, %v1496_v30  ;;  %1064 = vst.msk [vmem:[#allocation2 + $0x48] sm:$0xff] %vm585_vm1, %v1032_v32  ;;  %v1497_v39 = vadd.f32 %v1465_v36, %v1352_v3  ;;  %v1009_v19 = vld [vmem:[#allocation2 + $0x90] sm:$0xff] }
 0x156   : > { %v2137_v40 = vpack.c.bf16 %v1598_v33, %v1598_v33  ;;  %v1599_v41 = vadd.f32 %v2910_v17, %v1559_v38  ;;  %v1557_v42 = vld [vmem:[#allocation2 + $0x8] sm:$0xff]  ;;  %1531 = vst.msk [vmem:[#allocation2 + $0x38] sm:$0xff] %vm585_vm1, %v1499_v35  ;;  %v1010_v30 = vld [vmem:[#allocation2 + $0x98] sm:$0xff] }
 0x157   : > { %v2135_v43 = vpack.c.bf16 %v1596_v37, %v1596_v37  ;;  %v1597_v44 = vadd.f32 %v2910_v17, %v1557_v42  ;;  %1529 = vst.msk [vmem:[#allocation2 + $0x28] sm:$0xff] %vm585_vm1, %v1497_v39  ;;  %v2303_v45 = vpop.f32.mrb[28].mxu1  ;;  %v2934_v47 = vpop.f32.mrb[28].mxu0  ;;  %v1008_v36 = vld [vmem:[#allocation2 + $0x88] sm:$0xff] }
 0x158   : > { %1759 = vst.msk [vmem:[%s2925_s9 + $0x8] sm:$0xf] %vm1756_vm2, %v2137_v40  ;;  %v2138_v48 = vpack.c.bf16 %v1599_v41, %v1599_v41  ;;  %v1037_v49 = vadd.f32 %v2303_v45, %v1005_v46  ;;  %v912_v50 = vpop.f32.mrb[29].mxu1  ;;  %v2938_v52 = vpop.f32.mrb[29].mxu0 }
 0x159   : > { %1757 = vst.msk [vmem:[%s2925_s9] sm:$0xf] %vm1756_vm2, %v2135_v43  ;;  %v2136_v53 = vpack.c.bf16 %v1597_v44, %v1597_v44  ;;  %v1470_v54 = vld [vmem:[#allocation2 + $0x50] sm:$0xff]  ;;  %v1035_v55 = vadd.f32 %v1003_v51, %v912_v50  ;;  %v2304_v56 = vpop.f32.mrb[30].mxu1  ;;  %v2942_v58 = vpop.f32.mrb[30].mxu0 }
 0x15a   : > { %1760 = vst.msk [vmem:[%s2925_s9 + $0xc] sm:$0xf] %vm1756_vm2, %v2138_v48  ;;  %v1502_v59 = vadd.f32 %v2343_v12, %v1470_v54  ;;  %v1468_v60 = vld [vmem:[#allocation2 + $0x40] sm:$0xff]  ;;  %v1038_v61 = vadd.f32 %v2304_v56, %v1006_v57  ;;  %v915_v62 = vpop.f32.mrb[31].mxu1  ;;  %v2947_v0 = vpop.f32.mrb[31].mxu0 }
 0x15b   : > { %1069 = vst.msk [vmem:[#allocation2 + $0x70] sm:$0xff] %vm585_vm1, %v1037_v49  ;;  %v1562_v1 = vld [vmem:[#allocation2 + $0x30] sm:$0xff]  ;;  %1067 = vst.msk [vmem:[#allocation2 + $0x60] sm:$0xff] %vm585_vm1, %v1035_v55  ;;  %v1500_v2 = vadd.f32 %v1468_v60, %v2905_v16  ;;  %v1471_v3 = vld [vmem:[#allocation2 + $0x58] sm:$0xff]  ;;  %v1036_v4 = vadd.f32 %v1004_v63, %v915_v62 }
 0x15c   : > { %1758 = vst.msk [vmem:[%s2925_s9 + $0x4] sm:$0xf] %vm1756_vm2, %v2136_v53  ;;  %v1602_v5 = vadd.f32 %v2910_v17, %v1562_v1  ;;  %v1560_v6 = vld [vmem:[#allocation2 + $0x20] sm:$0xff]  ;;  %v1503_v7 = vadd.f32 %v2912_v22, %v1471_v3  ;;  %v1469_v8 = vld [vmem:[#allocation2 + $0x48] sm:$0xff]  ;;  %v1013_v55 = vld [vmem:[#allocation2 + $0xb0] sm:$0xff] }
 0x15d   : > { %1534 = vst.msk [vmem:[#allocation2 + $0x50] sm:$0xff] %vm585_vm1, %v1502_v59  ;;  %1070 = vst.msk [vmem:[#allocation2 + $0x78] sm:$0xff] %vm585_vm1, %v1038_v61  ;;  %v1600_v9 = vadd.f32 %v2910_v17, %v1560_v6  ;;  %v1563_v10 = vld [vmem:[#allocation2 + $0x38] sm:$0xff]  ;;  %v1501_v11 = vadd.f32 %v1469_v8, %v2916_v28  ;;  %v1011_v60 = vld [vmem:[#allocation2 + $0xa0] sm:$0xff] }
 0x15e   : > { %1532 = vst.msk [vmem:[#allocation2 + $0x40] sm:$0xff] %vm585_vm1, %v1500_v2  ;;  %1068 = vst.msk [vmem:[#allocation2 + $0x68] sm:$0xff] %vm585_vm1, %v1036_v4  ;;  %v2141_v12 = vpack.c.bf16 %v1602_v5, %v1602_v5  ;;  %v1603_v13 = vadd.f32 %v2910_v17, %v1563_v10  ;;  %v1561_v14 = vld [vmem:[#allocation2 + $0x28] sm:$0xff]  ;;  %v1014_v2 = vld [vmem:[#allocation2 + $0xb8] sm:$0xff] }
 0x15f   : > { %1535 = vst.msk [vmem:[#allocation2 + $0x58] sm:$0xff] %vm585_vm1, %v1503_v7  ;;  %v2139_v15 = vpack.c.bf16 %v1600_v9, %v1600_v9  ;;  %v1601_v16 = vadd.f32 %v2910_v17, %v1561_v14  ;;  %1533 = vst.msk [vmem:[#allocation2 + $0x48] sm:$0xff] %vm585_vm1, %v1501_v11  ;;  %v2307_v18 = vpop.f32.mrb[32].mxu1  ;;  %v2965_v20 = vpop.f32.mrb[32].mxu0  ;;  %v1012_v8 = vld [vmem:[#allocation2 + $0xa8] sm:$0xff] }
 0x160   : > { %1763 = vst.msk [vmem:[%s2925_s9 + $0x18] sm:$0xf] %vm1756_vm2, %v2141_v12  ;;  %v2142_v21 = vpack.c.bf16 %v1603_v13, %v1603_v13  ;;  %v1041_v22 = vadd.f32 %v2307_v18, %v1009_v19  ;;  %v928_v23 = vpop.f32.mrb[33].mxu1  ;;  %v2969_v25 = vpop.f32.mrb[33].mxu0 }
 0x161   : > { %1761 = vst.msk [vmem:[%s2925_s9 + $0x10] sm:$0xf] %vm1756_vm2, %v2139_v15  ;;  %v2140_v26 = vpack.c.bf16 %v1601_v16, %v1601_v16  ;;  %v1039_v28 = vadd.f32 %v1007_v24, %v928_v23  ;;  %v2308_v29 = vpop.f32.mrb[34].mxu1  ;;  %v2973_v31 = vpop.f32.mrb[34].mxu0 }
 0x162   : > { %v1474_v27 = vld [vmem:[#allocation2 + $0x70] sm:$0xff]  ;;  %1764 = vst.msk [vmem:[%s2925_s9 + $0x1c] sm:$0xf] %vm1756_vm2, %v2142_v21  ;;  %v1472_v33 = vld [vmem:[#allocation2 + $0x60] sm:$0xff]  ;;  %v1042_v34 = vadd.f32 %v2308_v29, %v1010_v30  ;;  %v931_v35 = vpop.f32.mrb[35].mxu1  ;;  %v2979_v37 = vpop.f32.mrb[35].mxu0 }
 0x163   : > { %1073 = vst.msk [vmem:[#allocation2 + $0x90] sm:$0xff] %vm585_vm1, %v1041_v22  ;;  %v1506_v32 = vadd.f32 %v2934_v47, %v1474_v27  ;;  %1071 = vst.msk [vmem:[#allocation2 + $0x80] sm:$0xff] %vm585_vm1, %v1039_v28  ;;  %v1504_v39 = vadd.f32 %v1472_v33, %v2938_v52  ;;  %v1040_v41 = vadd.f32 %v1008_v36, %v931_v35  ;;  %v1017_v28 = vld [vmem:[#allocation2 + $0xd0] sm:$0xff]  ;;  %v1015_v33 = vld [vmem:[#allocation2 + $0xc0] sm:$0xff] }
 0x164   : > { %1762 = vst.msk [vmem:[%s2925_s9 + $0x14] sm:$0xf] %vm1756_vm2, %v2140_v26  ;;  %v1566_v38 = vld [vmem:[#allocation2 + $0x50] sm:$0xff]  ;;  %v1475_v40 = vld [vmem:[#allocation2 + $0x78] sm:$0xff] }
 0x165   : > { %v1606_v42 = vadd.f32 %v2910_v17, %v1566_v38  ;;  %v1564_v43 = vld [vmem:[#allocation2 + $0x40] sm:$0xff]  ;;  %1538 = vst.msk [vmem:[#allocation2 + $0x70] sm:$0xff] %vm585_vm1, %v1506_v32  ;;  %1074 = vst.msk [vmem:[#allocation2 + $0x98] sm:$0xff] %vm585_vm1, %v1042_v34  ;;  %v1507_v44 = vadd.f32 %v2942_v58, %v1475_v40  ;;  %v1473_v45 = vld [vmem:[#allocation2 + $0x68] sm:$0xff] }
 0x166   : > { %v1604_v46 = vadd.f32 %v2910_v17, %v1564_v43  ;;  %v1567_v47 = vld [vmem:[#allocation2 + $0x58] sm:$0xff]  ;;  %1536 = vst.msk [vmem:[#allocation2 + $0x60] sm:$0xff] %vm585_vm1, %v1504_v39  ;;  %1072 = vst.msk [vmem:[#allocation2 + $0x88] sm:$0xff] %vm585_vm1, %v1040_v41  ;;  %v1505_v48 = vadd.f32 %v1473_v45, %v2947_v0  ;;  %v1565_v51 = vld [vmem:[#allocation2 + $0x48] sm:$0xff] }
 0x167   : > { %v2145_v49 = vpack.c.bf16 %v1606_v42, %v1606_v42  ;;  %v1607_v50 = vadd.f32 %v2910_v17, %v1567_v47  ;;  %1539 = vst.msk [vmem:[#allocation2 + $0x78] sm:$0xff] %vm585_vm1, %v1507_v44  ;;  %v1605_v53 = vadd.f32 %v2910_v17, %v1565_v51  ;;  %v2311_v54 = vpop.f32.mrb[36].mxu1  ;;  %v2997_v56 = vpop.f32.mrb[36].mxu0  ;;  %v1018_v39 = vld [vmem:[#allocation2 + $0xd8] sm:$0xff]  ;;  %v1016_v45 = vld [vmem:[#allocation2 + $0xc8] sm:$0xff] }
 0x168   : > { %v2143_v52 = vpack.c.bf16 %v1604_v46, %v1604_v46  ;;  %1537 = vst.msk [vmem:[#allocation2 + $0x68] sm:$0xff] %vm585_vm1, %v1505_v48  ;;  %v1045_v58 = vadd.f32 %v2311_v54, %v1013_v55  ;;  %v944_v59 = vpop.f32.mrb[37].mxu1  ;;  %v3001_v61 = vpop.f32.mrb[37].mxu0 }
 0x169   : > { %1767 = vst.msk [vmem:[%s2925_s9 + $0x28] sm:$0xf] %vm1756_vm2, %v2145_v49  ;;  %v2146_v57 = vpack.c.bf16 %v1607_v50, %v1607_v50  ;;  %v2144_v62 = vpack.c.bf16 %v1605_v53, %v1605_v53  ;;  %v1043_v0 = vadd.f32 %v1011_v60, %v944_v59  ;;  %v2312_v1 = vpop.f32.mrb[38].mxu1  ;;  %v3005_v3 = vpop.f32.mrb[38].mxu0 }
 0x16a   : > { %1765 = vst.msk [vmem:[%s2925_s9 + $0x20] sm:$0xf] %vm1756_vm2, %v2143_v52  ;;  %v1478_v63 = vld [vmem:[#allocation2 + $0x90] sm:$0xff]  ;;  %v1476_v5 = vld [vmem:[#allocation2 + $0x80] sm:$0xff]  ;;  %v1046_v6 = vadd.f32 %v2312_v1, %v1014_v2  ;;  %v947_v7 = vpop.f32.mrb[39].mxu1  ;;  %v3011_v9 = vpop.f32.mrb[39].mxu0 }
 0x16b   : > { %1768 = vst.msk [vmem:[%s2925_s9 + $0x2c] sm:$0xf] %vm1756_vm2, %v2146_v57  ;;  %v1510_v4 = vadd.f32 %v2965_v20, %v1478_v63  ;;  %1766 = vst.msk [vmem:[%s2925_s9 + $0x24] sm:$0xf] %vm1756_vm2, %v2144_v62  ;;  %v1508_v11 = vadd.f32 %v1476_v5, %v2969_v25  ;;  %v1044_v13 = vadd.f32 %v1012_v8, %v947_v7  ;;  %v1019_v5 = vld [vmem:[#allocation2 + $0xe0] sm:$0xff] }
 0x16c   : > { %1077 = vst.msk [vmem:[#allocation2 + $0xb0] sm:$0xff] %vm585_vm1, %v1045_v58  ;;  %v1570_v10 = vld [vmem:[#allocation2 + $0x70] sm:$0xff]  ;;  %1075 = vst.msk [vmem:[#allocation2 + $0xa0] sm:$0xff] %vm585_vm1, %v1043_v0  ;;  %v1479_v12 = vld [vmem:[#allocation2 + $0x98] sm:$0xff] }
 0x16d   : > { %v1610_v14 = vadd.f32 %v2910_v17, %v1570_v10  ;;  %v1568_v15 = vld [vmem:[#allocation2 + $0x60] sm:$0xff]  ;;  %1542 = vst.msk [vmem:[#allocation2 + $0x90] sm:$0xff] %vm585_vm1, %v1510_v4  ;;  %1078 = vst.msk [vmem:[#allocation2 + $0xb8] sm:$0xff] %vm585_vm1, %v1046_v6  ;;  %v1511_v16 = vadd.f32 %v2973_v31, %v1479_v12  ;;  %v1477_v18 = vld [vmem:[#allocation2 + $0x88] sm:$0xff] }
 0x16e   : > { %v1608_v19 = vadd.f32 %v2910_v17, %v1568_v15  ;;  %v1571_v20 = vld [vmem:[#allocation2 + $0x78] sm:$0xff]  ;;  %1540 = vst.msk [vmem:[#allocation2 + $0x80] sm:$0xff] %vm585_vm1, %v1508_v11  ;;  %1076 = vst.msk [vmem:[#allocation2 + $0xa8] sm:$0xff] %vm585_vm1, %v1044_v13  ;;  %v1509_v21 = vadd.f32 %v1477_v18, %v2979_v37  ;;  %v1021_v0 = vld [vmem:[#allocation2 + $0xf0] sm:$0xff] }
 0x16f   : > { %v2149_v22 = vpack.c.bf16 %v1610_v14, %v1610_v14  ;;  %v1611_v23 = vadd.f32 %v2910_v17, %v1571_v20  ;;  %v1569_v24 = vld [vmem:[#allocation2 + $0x68] sm:$0xff]  ;;  %1543 = vst.msk [vmem:[#allocation2 + $0x98] sm:$0xff] %vm585_vm1, %v1511_v16  ;;  %v2315_v27 = vpop.f32.mrb[40].mxu1  ;;  %v3029_v29 = vpop.f32.mrb[40].mxu0  ;;  %v1022_v11 = vld [vmem:[#allocation2 + $0xf8] sm:$0xff] }
 0x170   : > { %v2147_v25 = vpack.c.bf16 %v1608_v19, %v1608_v19  ;;  %v1609_v26 = vadd.f32 %v2910_v17, %v1569_v24  ;;  %1541 = vst.msk [vmem:[#allocation2 + $0x88] sm:$0xff] %vm585_vm1, %v1509_v21  ;;  %v1049_v31 = vadd.f32 %v2315_v27, %v1017_v28  ;;  %v960_v32 = vpop.f32.mrb[41].mxu1  ;;  %v3033_v34 = vpop.f32.mrb[41].mxu0  ;;  %v1020_v18 = vld [vmem:[#allocation2 + $0xe8] sm:$0xff] }
 0x171   : > { %1771 = vst.msk [vmem:[%s2925_s9 + $0x38] sm:$0xf] %vm1756_vm2, %v2149_v22  ;;  %v2150_v30 = vpack.c.bf16 %v1611_v23, %v1611_v23  ;;  %v1047_v37 = vadd.f32 %v1015_v33, %v960_v32  ;;  %v2316_v38 = vpop.f32.mrb[42].mxu1  ;;  %v3037_v40 = vpop.f32.mrb[42].mxu0 }
 0x172   : > { %1769 = vst.msk [vmem:[%s2925_s9 + $0x30] sm:$0xf] %vm1756_vm2, %v2147_v25  ;;  %v2148_v35 = vpack.c.bf16 %v1609_v26, %v1609_v26  ;;  %v1050_v43 = vadd.f32 %v2316_v38, %v1018_v39  ;;  %v963_v44 = vpop.f32.mrb[43].mxu1  ;;  %v3043_v46 = vpop.f32.mrb[43].mxu0 }
 0x173   : > { %v1482_v36 = vld [vmem:[#allocation2 + $0xb0] sm:$0xff]  ;;  %1772 = vst.msk [vmem:[%s2925_s9 + $0x3c] sm:$0xf] %vm1756_vm2, %v2150_v30  ;;  %v1480_v42 = vld [vmem:[#allocation2 + $0xa0] sm:$0xff]  ;;  %v1048_v50 = vadd.f32 %v1016_v45, %v963_v44 }
 0x174   : > { %1081 = vst.msk [vmem:[#allocation2 + $0xd0] sm:$0xff] %vm585_vm1, %v1049_v31  ;;  %v1514_v41 = vadd.f32 %v2997_v56, %v1482_v36  ;;  %v1574_v47 = vld [vmem:[#allocation2 + $0x90] sm:$0xff]  ;;  %1079 = vst.msk [vmem:[#allocation2 + $0xc0] sm:$0xff] %vm585_vm1, %v1047_v37  ;;  %v1512_v48 = vadd.f32 %v1480_v42, %v3001_v61  ;;  %v1483_v49 = vld [vmem:[#allocation2 + $0xb8] sm:$0xff] }
 0x175   : > { %1770 = vst.msk [vmem:[%s2925_s9 + $0x34] sm:$0xf] %vm1756_vm2, %v2148_v35  ;;  %v1614_v51 = vadd.f32 %v2910_v17, %v1574_v47  ;;  %v1572_v52 = vld [vmem:[#allocation2 + $0x80] sm:$0xff]  ;;  %v1515_v53 = vadd.f32 %v3005_v3, %v1483_v49  ;;  %v1481_v54 = vld [vmem:[#allocation2 + $0xa8] sm:$0xff] }
 0x176   : > { %1546 = vst.msk [vmem:[#allocation2 + $0xb0] sm:$0xff] %vm585_vm1, %v1514_v41  ;;  %1082 = vst.msk [vmem:[#allocation2 + $0xd8] sm:$0xff] %vm585_vm1, %v1050_v43  ;;  %v1612_v55 = vadd.f32 %v2910_v17, %v1572_v52  ;;  %v1575_v56 = vld [vmem:[#allocation2 + $0x98] sm:$0xff]  ;;  %v1513_v57 = vadd.f32 %v1481_v54, %v3011_v9 }
 0x177   : > { %1544 = vst.msk [vmem:[#allocation2 + $0xa0] sm:$0xff] %vm585_vm1, %v1512_v48  ;;  %1080 = vst.msk [vmem:[#allocation2 + $0xc8] sm:$0xff] %vm585_vm1, %v1048_v50  ;;  %v2153_v58 = vpack.c.bf16 %v1614_v51, %v1614_v51  ;;  %v1615_v59 = vadd.f32 %v2910_v17, %v1575_v56  ;;  %v1573_v60 = vld [vmem:[#allocation2 + $0x88] sm:$0xff]  ;;  %v2319_v63 = vpop.f32.mrb[44].mxu1  ;;  %v2363_v1 = vpop.f32.mrb[44].mxu0 }
 0x178   : > { %1547 = vst.msk [vmem:[#allocation2 + $0xb8] sm:$0xff] %vm585_vm1, %v1515_v53  ;;  %v2151_v61 = vpack.c.bf16 %v1612_v55, %v1612_v55  ;;  %v1613_v62 = vadd.f32 %v2910_v17, %v1573_v60  ;;  %1545 = vst.msk [vmem:[#allocation2 + $0xa8] sm:$0xff] %vm585_vm1, %v1513_v57  ;;  %v1053_v3 = vadd.f32 %v2319_v63, %v1021_v0  ;;  %v976_v4 = vpop.f32.mrb[45].mxu1  ;;  %v1445_v6 = vpop.f32.mrb[45].mxu0 }
 0x179   : > { %1775 = vst.msk [vmem:[%s2925_s9 + $0x48] sm:$0xf] %vm1756_vm2, %v2153_v58  ;;  %v2154_v2 = vpack.c.bf16 %v1615_v59, %v1615_v59  ;;  %v1051_v9 = vadd.f32 %v1019_v5, %v976_v4  ;;  %v2320_v10 = vpop.f32.mrb[46].mxu1  ;;  %v2364_v12 = vpop.f32.mrb[46].mxu0 }
 0x17a   : > { %1773 = vst.msk [vmem:[%s2925_s9 + $0x40] sm:$0xf] %vm1756_vm2, %v2151_v61  ;;  %v2152_v7 = vpack.c.bf16 %v1613_v62, %v1613_v62  ;;  %v1054_v15 = vadd.f32 %v2320_v10, %v1022_v11  ;;  %v979_v16 = vpop.f32.mrb[47].mxu1  ;;  %v1448_v19 = vpop.f32.mrb[47].mxu0 }
 0x17b   : > { %v1486_v8 = vld [vmem:[#allocation2 + $0xd0] sm:$0xff]  ;;  %1776 = vst.msk [vmem:[%s2925_s9 + $0x4c] sm:$0xf] %vm1756_vm2, %v2154_v2  ;;  %v1484_v14 = vld [vmem:[#allocation2 + $0xc0] sm:$0xff]  ;;  %v1052_v23 = vadd.f32 %v1020_v18, %v979_v16 }
 0x17c   : > { %1085 = vst.msk [vmem:[#allocation2 + $0xf0] sm:$0xff] %vm585_vm1, %v1053_v3  ;;  %v1518_v13 = vadd.f32 %v3029_v29, %v1486_v8  ;;  %1083 = vst.msk [vmem:[#allocation2 + $0xe0] sm:$0xff] %vm585_vm1, %v1051_v9  ;;  %v1516_v21 = vadd.f32 %v1484_v14, %v3033_v34 }
 0x17d   : > { %1774 = vst.msk [vmem:[%s2925_s9 + $0x44] sm:$0xf] %vm1756_vm2, %v2152_v7  ;;  %v1578_v20 = vld [vmem:[#allocation2 + $0xb0] sm:$0xff]  ;;  %v1487_v22 = vld [vmem:[#allocation2 + $0xd8] sm:$0xff] }
 0x17e   : > { %v1618_v24 = vadd.f32 %v2910_v17, %v1578_v20  ;;  %v1576_v25 = vld [vmem:[#allocation2 + $0xa0] sm:$0xff]  ;;  %1550 = vst.msk [vmem:[#allocation2 + $0xd0] sm:$0xff] %vm585_vm1, %v1518_v13  ;;  %1086 = vst.msk [vmem:[#allocation2 + $0xf8] sm:$0xff] %vm585_vm1, %v1054_v15  ;;  %v1519_v26 = vadd.f32 %v3037_v40, %v1487_v22  ;;  %v1485_v27 = vld [vmem:[#allocation2 + $0xc8] sm:$0xff] }
 0x17f   : > { %v1616_v28 = vadd.f32 %v2910_v17, %v1576_v25  ;;  %v1579_v29 = vld [vmem:[#allocation2 + $0xb8] sm:$0xff]  ;;  %1548 = vst.msk [vmem:[#allocation2 + $0xc0] sm:$0xff] %vm585_vm1, %v1516_v21  ;;  %1084 = vst.msk [vmem:[#allocation2 + $0xe8] sm:$0xff] %vm585_vm1, %v1052_v23  ;;  %v1517_v30 = vadd.f32 %v1485_v27, %v3043_v46  ;;  %v1577_v33 = vld [vmem:[#allocation2 + $0xa8] sm:$0xff] }
 0x180   : > { %v2157_v31 = vpack.c.bf16 %v1618_v24, %v1618_v24  ;;  %v1619_v32 = vadd.f32 %v2910_v17, %v1579_v29  ;;  %1551 = vst.msk [vmem:[#allocation2 + $0xd8] sm:$0xff] %vm585_vm1, %v1519_v26  ;;  %v1617_v35 = vadd.f32 %v2910_v17, %v1577_v33 }
 0x181   : > { %v2155_v34 = vpack.c.bf16 %v1616_v28, %v1616_v28  ;;  %1549 = vst.msk [vmem:[#allocation2 + $0xc8] sm:$0xff] %vm585_vm1, %v1517_v30 }
 0x182   : > { %1779 = vst.msk [vmem:[%s2925_s9 + $0x58] sm:$0xf] %vm1756_vm2, %v2157_v31  ;;  %v2158_v36 = vpack.c.bf16 %v1619_v32, %v1619_v32  ;;  %v2156_v37 = vpack.c.bf16 %v1617_v35, %v1617_v35 }
 0x183   : > { %1777 = vst.msk [vmem:[%s2925_s9 + $0x50] sm:$0xf] %vm1756_vm2, %v2155_v34  ;;  %v1490_v38 = vld [vmem:[#allocation2 + $0xf0] sm:$0xff]  ;;  %v1488_v40 = vld [vmem:[#allocation2 + $0xe0] sm:$0xff] }
 0x184   : > { %1780 = vst.msk [vmem:[%s2925_s9 + $0x5c] sm:$0xf] %vm1756_vm2, %v2158_v36  ;;  %v1522_v39 = vadd.f32 %v2363_v1, %v1490_v38  ;;  %1778 = vst.msk [vmem:[%s2925_s9 + $0x54] sm:$0xf] %vm1756_vm2, %v2156_v37  ;;  %v1520_v42 = vadd.f32 %v1488_v40, %v1445_v6 }
 0x185   : > { %v1582_v41 = vld [vmem:[#allocation2 + $0xd0] sm:$0xff]  ;;  %v1491_v43 = vld [vmem:[#allocation2 + $0xf8] sm:$0xff] }
 0x186   : > { %v1622_v44 = vadd.f32 %v2910_v17, %v1582_v41  ;;  %v1580_v45 = vld [vmem:[#allocation2 + $0xc0] sm:$0xff]  ;;  %1554 = vst.msk [vmem:[#allocation2 + $0xf0] sm:$0xff] %vm585_vm1, %v1522_v39  ;;  %v1523_v46 = vadd.f32 %v2364_v12, %v1491_v43  ;;  %v1489_v47 = vld [vmem:[#allocation2 + $0xe8] sm:$0xff]  ;;  %1552 = vst.msk [vmem:[#allocation2 + $0xe0] sm:$0xff] %vm585_vm1, %v1520_v42 }
 0x187   : > { %v1620_v48 = vadd.f32 %v2910_v17, %v1580_v45  ;;  %v1583_v49 = vld [vmem:[#allocation2 + $0xd8] sm:$0xff]  ;;  %v1521_v50 = vadd.f32 %v1489_v47, %v1448_v19 }
 0x188   : > { %v2161_v51 = vpack.c.bf16 %v1622_v44, %v1622_v44  ;;  %v1623_v52 = vadd.f32 %v2910_v17, %v1583_v49  ;;  %v1581_v53 = vld [vmem:[#allocation2 + $0xc8] sm:$0xff]  ;;  %1555 = vst.msk [vmem:[#allocation2 + $0xf8] sm:$0xff] %vm585_vm1, %v1523_v46 }
 0x189   : > { %v2159_v54 = vpack.c.bf16 %v1620_v48, %v1620_v48  ;;  %v1621_v55 = vadd.f32 %v2910_v17, %v1581_v53  ;;  %1553 = vst.msk [vmem:[#allocation2 + $0xe8] sm:$0xff] %vm585_vm1, %v1521_v50 }
 0x18a   : > { %1783 = vst.msk [vmem:[%s2925_s9 + $0x68] sm:$0xf] %vm1756_vm2, %v2161_v51  ;;  %v2162_v56 = vpack.c.bf16 %v1623_v52, %v1623_v52 }
 0x18b   : > { %1781 = vst.msk [vmem:[%s2925_s9 + $0x60] sm:$0xf] %vm1756_vm2, %v2159_v54  ;;  %v2160_v57 = vpack.c.bf16 %v1621_v55, %v1621_v55 }
 0x18c   : > { %1784 = vst.msk [vmem:[%s2925_s9 + $0x6c] sm:$0xf] %vm1756_vm2, %v2162_v56 }
 0x18d   : > { %1782 = vst.msk [vmem:[%s2925_s9 + $0x64] sm:$0xf] %vm1756_vm2, %v2160_v57  ;;  %v1586_v58 = vld [vmem:[#allocation2 + $0xf0] sm:$0xff]  ;;  %v1584_v60 = vld [vmem:[#allocation2 + $0xe0] sm:$0xff] }
 0x18e   : > { %v1626_v59 = vadd.f32 %v2910_v17, %v1586_v58  ;;  %v1624_v61 = vadd.f32 %v2910_v17, %v1584_v60 }
 0x18f   : > { %v1587_v62 = vld [vmem:[#allocation2 + $0xf8] sm:$0xff] }
 0x190   : > { %v2165_v63 = vpack.c.bf16 %v1626_v59, %v1626_v59  ;;  %v1627_v0 = vadd.f32 %v2910_v17, %v1587_v62  ;;  %v1585_v1 = vld [vmem:[#allocation2 + $0xe8] sm:$0xff]  ;;  %v2163_v2 = vpack.c.bf16 %v1624_v61, %v1624_v61 }
 0x191   : > { %v1625_v3 = vadd.f32 %v2910_v17, %v1585_v1 }
 0x192   : > { %1787 = vst.msk [vmem:[%s2925_s9 + $0x78] sm:$0xf] %vm1756_vm2, %v2165_v63  ;;  %v2166_v4 = vpack.c.bf16 %v1627_v0, %v1627_v0  ;;  %1785 = vst.msk [vmem:[%s2925_s9 + $0x70] sm:$0xf] %vm1756_vm2, %v2163_v2 }
 0x193   : > { %v2164_v5 = vpack.c.bf16 %v1625_v3, %v1625_v3 }
 0x194   : > { %1788 = vst.msk [vmem:[%s2925_s9 + $0x7c] sm:$0xf] %vm1756_vm2, %v2166_v4 }
 0x195   : > { %1786 = vst.msk [vmem:[%s2925_s9 + $0x74] sm:$0xf] %vm1756_vm2, %v2164_v5 }
 0x196 PF: > { %s16_s17 = sadd.s32 1, %s2583_s17   ;;  %s3145_s12 = smov %s2567_s13 }
 0x197   : > { %p13_p9 = scmp.ge.s32.totalorder %s16_s17, 4   ;;  %s3146_s13 = smov %s2571_s14 }
 0x198   : > { %s3147_s14 = smov %s2653_s23  ;;  %s3148_s15 = smov %s2579_s16 }
 0x199   : > { %s3149_s16 = smov %s3151_s19  ;;  %15 = sbr.rel (!%p13_p9) target bundleno = 4 (0x4), region = 78 }
 0x1a0   :  { %1816 = vsyncpa [#allocation4], 1 }
 0x1a1   :  { %1818 = vsyncpa [#allocation4 + $0x1], 1 }

</bundles_post_ra>
